<compile_context>
chip_gen: v6e
topology: v6e:2x2x1
jax: 0.10.0
libtpu: 0.0.40
codegen_flags: <defaults>
</compile_context>

<pallas_src>
import functools
from math import log

import jax
import jax.numpy as jnp
from jax.experimental import pallas as pl
from jax.experimental.pallas import tpu as pltpu

LOG_MAX = log(100.0)
LOG_MIN = log(0.0001)

_VMEM_LIMIT = 32 * 1024 * 1024            # safe on v5e/v6e (128 MiB) and v7x (64 MiB)
_FULL_VMEM = pl.BlockSpec(memory_space=pltpu.MemorySpace.VMEM)


def _round_up(x, m):
    return (x + m - 1) // m * m


# ----------------------------------------------------------------------------
# Pallas kernels
# ----------------------------------------------------------------------------
def _matmul_bias_act_kernel(x_ref, w_ref, b_ref, o_ref, *, act):
    """o = act(x @ w + b) on one M-tile; bf16 operands, f32 accumulate/epilogue."""
    y = jnp.dot(x_ref[...], w_ref[...], preferred_element_type=jnp.float32)
    y = y + b_ref[...]
    if act == "leaky_relu":
        y = jnp.where(y >= 0.0, y, 0.2 * y)            # LeakyReLU(0.2)
    o_ref[...] = y.astype(o_ref.dtype)


def _matmul_act_kernel(x_ref, w_ref, o_ref, *, act):
    """Same as above, bias-free (head conv has bias=False)."""
    y = jnp.dot(x_ref[...], w_ref[...], preferred_element_type=jnp.float32)
    if act == "leaky_relu":
        y = jnp.where(y >= 0.0, y, 0.2 * y)
    o_ref[...] = y.astype(o_ref.dtype)


def _conv_ca_kernel(p_ref, w_ref, b_ref, w1_ref, b1_ref, w2_ref, b2_ref,
                    y_ref, s_ref, *, hw_true, tm):
    """Conv2 of a RB block fused with CALayer statistics.

    Grid = (N batch [parallel], H*W tiles [arbitrary]).  The conv output tile is
    written out; per-image channel sums are accumulated into the resident s_ref
    block, and on the last tile the 1x1-conv MLP + sigmoid produces the scale.
    """
    h = pl.program_id(1)

    @pl.when(h == 0)
    def _init():
        s_ref[...] = jnp.zeros_like(s_ref)

    y = jnp.dot(p_ref[0], w_ref[...], preferred_element_type=jnp.float32)
    y = y + b_ref[...]
    y_ref[0] = y.astype(y_ref.dtype)

    # Mask rows beyond the true H*W (padding rows would otherwise add bias terms).
    row = h * tm + jax.lax.broadcasted_iota(jnp.int32, (tm, 1), 0)
    y_masked = jnp.where(row < hw_true, y, 0.0)
    s_ref[0] = s_ref[0] + jnp.sum(y_masked, axis=0, keepdims=True)

    @pl.when(h == pl.num_programs(1) - 1)
    def _finalize():
        mean = s_ref[0] * (1.0 / hw_true)                               # (1, C)
        z = jnp.dot(mean, w1_ref[...], preferred_element_type=jnp.float32) + b1_ref[...]
        z = jnp.where(z >= 0.0, z, 0.2 * z)                             # LeakyReLU(0.2)
        z = jnp.dot(z, w2_ref[...], preferred_element_type=jnp.float32) + b2_ref[...]
        s_ref[0] = pl.reciprocal(1.0 + jnp.exp(-z), approx=True)        # sigmoid (EUP)


def _scale_residual_kernel(y_ref, r_ref, s_ref, o_ref):
    """RB_Layer tail: out = conv2_out * channel_scale + residual (f32 math)."""
    y = y_ref[0].astype(jnp.float32)
    r = r_ref[0].astype(jnp.float32)
    o_ref[0] = (y * s_ref[0] + r).astype(o_ref.dtype)


def _tail_head_kernel(x_ref, w_ref, b_ref, o_ref):
    """Pooled tail conv + exp(clamp(out[:, :2])) / tanh(out[:, 2]) head."""
    y = jnp.dot(x_ref[...], w_ref[...], preferred_element_type=jnp.float32) + b_ref[...]
    lam = jnp.exp(jnp.clip(y, LOG_MIN, LOG_MAX))
    rho = jnp.tanh(y)
    ch = jax.lax.broadcasted_iota(jnp.int32, y.shape, 1)
    o_ref[...] = jnp.where(ch < 2, lam, rho)


# ----------------------------------------------------------------------------
# Wrappers (padding / im2col / reshapes are XLA glue)
# ----------------------------------------------------------------------------
def _im2col(x_nhwc, ksize, stride, pad):
    N, H, W, C = x_nhwc.shape
    Ho = (H + 2 * pad - ksize) // stride + 1
    Wo = (W + 2 * pad - ksize) // stride + 1
    xp = jnp.pad(x_nhwc, ((0, 0), (pad, pad), (pad, pad), (0, 0)))
    cols = []
    for kh in range(ksize):
        for kw in range(ksize):
            cols.append(xp[:, kh:kh + stride * Ho:stride, kw:kw + stride * Wo:stride, :])
    return jnp.concatenate(cols, axis=-1), Ho, Wo      # (N, Ho, Wo, K*K*C)


def _tiled_matmul(x, w, b=None, act="none", out_dtype=jnp.bfloat16, tm=512):
    """act(x @ w (+ b)) with an M-tiled, pipelined, megacore-parallel Pallas kernel."""
    M, K = x.shape
    _, N = w.shape
    tm = min(tm, _round_up(M, 16))
    Mp = _round_up(M, tm)
    if Mp != M:
        x = jnp.pad(x, ((0, Mp - M), (0, 0)))

    in_specs = [pl.BlockSpec((tm, K), lambda i: (i, 0)),
                pl.BlockSpec((K, N), lambda i: (0, 0))]
    operands = [x, w]
    if b is not None:
        in_specs.append(pl.BlockSpec((1, N), lambda i: (0, 0)))
        operands.append(b)
        kernel = functools.partial(_matmul_bias_act_kernel, act=act)
    else:
        kernel = functools.partial(_matmul_act_kernel, act=act)

    y = pl.pallas_call(
        kernel,
        out_shape=jax.ShapeDtypeStruct((Mp, N), out_dtype),
        grid=(Mp // tm,),
        in_specs=in_specs,
        out_specs=pl.BlockSpec((tm, N), lambda i: (i, 0)),
        compiler_params=pltpu.CompilerParams(
            dimension_semantics=("parallel",),
            vmem_limit_bytes=_VMEM_LIMIT),
    )(*operands)
    return y[:M] if Mp != M else y


def conv2d(x_nhwc, w_mat, b_row, ksize, stride, pad, act="none"):
    """PyTorch-equivalent Conv2d via im2col + tiled Pallas matmul (bf16 operands)."""
    N = x_nhwc.shape[0]
    patches, Ho, Wo = _im2col(x_nhwc, ksize, stride, pad)
    K = patches.shape[-1]
    Cout = w_mat.shape[1]
    y = _tiled_matmul(patches.reshape(N * Ho * Wo, K), w_mat, b_row, act=act)
    return y.reshape(N, Ho, Wo, Cout)


def _conv2_with_ca(t_nhwc, blk, tm_max=256):
    """Fused conv2 + channel-attention statistics/MLP of one RB block."""
    N, H, W, C = t_nhwc.shape
    patches, Ho, Wo = _im2col(t_nhwc, 3, 1, 1)
    HW = Ho * Wo
    K = patches.shape[-1]
    tm = min(tm_max, _round_up(HW, 16))
    HWp = _round_up(HW, tm)
    p = patches.reshape(N, HW, K)
    if HWp != HW:
        p = jnp.pad(p, ((0, 0), (0, HWp - HW), (0, 0)))
    Cr = blk["ca_w1"].shape[1]

    y_p, scale = pl.pallas_call(
        functools.partial(_conv_ca_kernel, hw_true=HW, tm=tm),
        out_shape=(jax.ShapeDtypeStruct((N, HWp, C), jnp.bfloat16),
                   jax.ShapeDtypeStruct((N, 1, C), jnp.float32)),
        grid=(N, HWp // tm),
        in_specs=[pl.BlockSpec((1, tm, K), lambda n, h: (n, h, 0)),
                  pl.BlockSpec((K, C), lambda n, h: (0, 0)),
                  pl.BlockSpec((1, C), lambda n, h: (0, 0)),
                  pl.BlockSpec((C, Cr), lambda n, h: (0, 0)),
                  pl.BlockSpec((1, Cr), lambda n, h: (0, 0)),
                  pl.BlockSpec((Cr, C), lambda n, h: (0, 0)),
                  pl.BlockSpec((1, C), lambda n, h: (0, 0))],
        out_specs=(pl.BlockSpec((1, tm, C), lambda n, h: (n, h, 0)),
                   pl.BlockSpec((1, 1, C), lambda n, h: (n, 0, 0))),
        compiler_params=pltpu.CompilerParams(
            dimension_semantics=("parallel", "arbitrary"),
            vmem_limit_bytes=_VMEM_LIMIT),
    )(p, blk["w2"], blk["b2"], blk["ca_w1"], blk["ca_b1"], blk["ca_w2"], blk["ca_b2"])
    return y_p, scale, HWp, tm


def _scale_residual(y_p, res_p, scale, tm):
    N, HWp, C = y_p.shape
    return pl.pallas_call(
        _scale_residual_kernel,
        out_shape=jax.ShapeDtypeStruct((N, HWp, C), jnp.bfloat16),
        grid=(N, HWp // tm),
        in_specs=[pl.BlockSpec((1, tm, C), lambda n, h: (n, h, 0)),
                  pl.BlockSpec((1, tm, C), lambda n, h: (n, h, 0)),
                  pl.BlockSpec((1, 1, C), lambda n, h: (n, 0, 0))],
        out_specs=pl.BlockSpec((1, tm, C), lambda n, h: (n, h, 0)),
        compiler_params=pltpu.CompilerParams(
            dimension_semantics=("parallel", "parallel"),
            vmem_limit_bytes=_VMEM_LIMIT),
    )(y_p, res_p, scale)


def rb_block(x_nhwc, blk):
    """RB_Layer: conv3x3 + LeakyReLU + conv3x3 + CALayer, plus residual add."""
    N, H, W, C = x_nhwc.shape
    t = conv2d(x_nhwc, blk["w1"], blk["b1"], 3, 1, 1, act="leaky_relu")
    y_p, scale, HWp, tm = _conv2_with_ca(t, blk)
    res = x_nhwc.reshape(N, H * W, C)
    if HWp != H * W:
        res = jnp.pad(res, ((0, 0), (0, HWp - H * W), (0, 0)))
    out_p = _scale_residual(y_p, res, scale, tm)
    return out_p[:, :H * W, :].reshape(N, H, W, C)


def tail_head(x_nhwc, w_mat, b_row):
    """tail conv3x3 folded with AdaptiveAvgPool2d((1,1)), then exp/tanh head."""
    N, H, W, C = x_nhwc.shape
    xf = jnp.pad(x_nhwc.astype(jnp.float32), ((0, 0), (1, 1), (1, 1), (0, 0)))
    means = [jnp.mean(xf[:, kh:kh + H, kw:kw + W, :], axis=(1, 2))
             for kh in range(3) for kw in range(3)]
    xmean = jnp.concatenate(means, axis=-1)              # (N, 9*C) f32
    out = pl.pallas_call(
        _tail_head_kernel,
        out_shape=jax.ShapeDtypeStruct((N, w_mat.shape[1]), jnp.float32),
        in_specs=[_FULL_VMEM, _FULL_VMEM, _FULL_VMEM],
        out_specs=_FULL_VMEM,
        compiler_params=pltpu.CompilerParams(vmem_limit_bytes=_VMEM_LIMIT),
    )(xmean, w_mat, b_row)
    return out.reshape(N, w_mat.shape[1], 1, 1)


# ----------------------------------------------------------------------------
# Parameter preparation + forward pass
# ----------------------------------------------------------------------------
def _wmat(w_oihw, dtype):
    Cout, Cin, KH, KW = w_oihw.shape
    # (Cout, Cin, KH, KW) -> (KH, KW, Cin, Cout) -> (KH*KW*Cin, Cout), matching im2col.
    return jnp.transpose(w_oihw, (2, 3, 1, 0)).reshape(KH * KW * Cin, Cout).astype(dtype)


def prepare_params(params):
    p = {
        "head_w": _wmat(params["head_w"], jnp.bfloat16),
        "tail_w": _wmat(params["tail_w"], jnp.float32),
        "tail_b": params["tail_b"].reshape(1, -1).astype(jnp.float32),
        "blocks": [],
    }
    for blk in params["blocks"]:
        cr = blk["ca_w1"].shape[0]
        nf = blk["ca_w2"].shape[0]
        p["blocks"].append({
            "w1": _wmat(blk["w1"], jnp.bfloat16),
            "b1": blk["b1"].reshape(1, -1).astype(jnp.float32),
            "w2": _wmat(blk["w2"], jnp.bfloat16),
            "b2": blk["b2"].reshape(1, -1).astype(jnp.float32),
            "ca_w1": blk["ca_w1"].reshape(cr, nf).T.astype(jnp.float32),   # (C, Cr)
            "ca_b1": blk["ca_b1"].reshape(1, -1).astype(jnp.float32),
            "ca_w2": blk["ca_w2"].reshape(nf, cr).T.astype(jnp.float32),   # (Cr, C)
            "ca_b2": blk["ca_b2"].reshape(1, -1).astype(jnp.float32),
        })
    return p


def kernelnet_forward(x_nchw, params):
    p = prepare_params(params)
    x = jnp.transpose(x_nchw, (0, 2, 3, 1)).astype(jnp.bfloat16)   # NCHW -> NHWC, bf16
    # head: Conv2d(in_nc, nf, kernel_size=9, stride=4, padding=4, bias=False)
    x = conv2d(x, p["head_w"], None, 9, 4, 4)
    # body: num_blocks x RB_Layer
    for blk in p["blocks"]:
        x = rb_block(x, blk)
    # tail: Conv2d(nf, 3, 3, 1, 1) + AdaptiveAvgPool2d((1,1)) + exp/tanh head
    return tail_head(x, p["tail_w"], p["tail_b"])                  # (N, 3, 1, 1)


# ----------------------------------------------------------------------------
# Deterministic parameter init (PyTorch conv-style uniform fan-in bounds)
# ----------------------------------------------------------------------------
def init_params(key, in_nc=3, out_chn=3, nf=64, num_blocks=8, reduction=16):
    keys = iter(jax.random.split(key, 4 + 8 * num_blocks))

    def conv_w(cout, cin, k):
        bound = 1.0 / ((cin * k * k) ** 0.5)
        return jax.random.uniform(next(keys), (cout, cin, k, k), jnp.float32,
                                  -bound, bound)

    def conv_b(cout, cin, k):
        bound = 1.0 / ((cin * k * k) ** 0.5)
        return jax.random.uniform(next(keys), (cout,), jnp.float32, -bound, bound)

    params = {"head_w": conv_w(nf, in_nc, 9)}
    blocks = []
    for _ in range(num_blocks):
        blocks.append({
            "w1": conv_w(nf, nf, 3), "b1": conv_b(nf, nf, 3),
            "w2": conv_w(nf, nf, 3), "b2": conv_b(nf, nf, 3),
            "ca_w1": conv_w(nf // reduction, nf, 1),
            "ca_b1": conv_b(nf // reduction, nf, 1),
            "ca_w2": conv_w(nf, nf // reduction, 1),
            "ca_b2": conv_b(nf, nf // reduction, 1),
        })
    params["blocks"] = blocks
    params["tail_w"] = conv_w(out_chn, nf, 3)
    params["tail_b"] = conv_b(out_chn, nf, 3)
    return params


if __name__ == "__main__":
    key = jax.random.PRNGKey(0)
    pkey, xkey = jax.random.split(key)
    params = init_params(pkey, in_nc=3, out_chn=3, nf=64, num_blocks=8)
    x = jax.random.normal(xkey, (2, 3, 16, 16), jnp.float32)       # NCHW like PyTorch
    fwd = jax.jit(kernelnet_forward)
    out = fwd(x, params)
    jax.block_until_ready(out)
    assert out.shape == (2, 3, 1, 1) and out.dtype == jnp.float32
    print("KERNEL_OK")
</pallas_src>

<mosaic_0001>
module attributes {stable_mosaic.version = 11 : i64} {
  func.func @_matmul_act_kernel(%arg0: i32, %arg1: memref<32x243xbf16, #tpu.memory_space<vmem>>, %arg2: memref<243x64xbf16, #tpu.memory_space<vmem>>, %arg3: memref<32x64xbf16, #tpu.memory_space<vmem>>) attributes {dimension_semantics = [#tpu.dimension_semantics<parallel>], iteration_bounds = array<i64: 1>, scalar_prefetch = 0 : i64, scratch_operands = 0 : i64, tpu.core_type = #tpu.core_type<tc>, window_params = [{transform_indices = @transform_0, window_bounds = array<i64: 32, 243>}, {pipeline_mode = #tpu.pipeline_mode<synchronous>, transform_indices = @transform_1, window_bounds = array<i64: 243, 64>}, {transform_indices = @transform_2, window_bounds = array<i64: 32, 64>}]} {
    %c0 = arith.constant 0 : index
    %c0_0 = arith.constant 0 : index
    %0 = vector.load %arg1[%c0, %c0_0] : memref<32x243xbf16, #tpu.memory_space<vmem>>, vector<32x243xbf16>
    %c0_1 = arith.constant 0 : index
    %c0_2 = arith.constant 0 : index
    %1 = vector.load %arg2[%c0_1, %c0_2] : memref<243x64xbf16, #tpu.memory_space<vmem>>, vector<243x64xbf16>
    %cst = arith.constant dense<0.000000e+00> : vector<32x64xf32>
    %2 = tpu.matmul %0, %1, %cst {dimension_numbers = #tpu.dot_dimension_numbers<[1], [0], [0], [1], [0, 0, 1, 1], [], []>} : vector<32x243xbf16>, vector<243x64xbf16>, vector<32x64xf32> -> vector<32x64xf32>
    %3 = arith.truncf %2 : vector<32x64xf32> to vector<32x64xbf16>
    %c0_3 = arith.constant 0 : index
    %c0_4 = arith.constant 0 : index
    %4 = vector.load %arg3[%c0_3, %c0_4] : memref<32x64xbf16, #tpu.memory_space<vmem>>, vector<32x64xbf16>
    tpu.vector_store %arg3[%c0_3, %c0_4], %3 {strides = array<i32>} : memref<32x64xbf16, #tpu.memory_space<vmem>>, vector<32x64xbf16>,
    return
  }
  func.func @transform_0(%arg0: i32) -> (i32, i32) {
    %c0_i32 = arith.constant 0 : i32
    %c0_i32_0 = arith.constant 0 : i32
    return %arg0, %c0_i32 : i32, i32
  }
  func.func @transform_1(%arg0: i32) -> (i32, i32) {
    %c0_i32 = arith.constant 0 : i32
    %c0_i32_0 = arith.constant 0 : i32
    %c0_i32_1 = arith.constant 0 : i32
    return %c0_i32, %c0_i32_0 : i32, i32
  }
  func.func @transform_2(%arg0: i32) -> (i32, i32) {
    %c0_i32 = arith.constant 0 : i32
    %c0_i32_0 = arith.constant 0 : i32
    return %arg0, %c0_i32 : i32, i32
  }
}

module attributes {stable_mosaic.version = 11 : i64} {
  func.func @_matmul_bias_act_kernel(%arg0: i32, %arg1: memref<32x576xbf16, #tpu.memory_space<vmem>>, %arg2: memref<576x64xbf16, #tpu.memory_space<vmem>>, %arg3: memref<1x64xf32, #tpu.memory_space<vmem>>, %arg4: memref<32x64xbf16, #tpu.memory_space<vmem>>) attributes {dimension_semantics = [#tpu.dimension_semantics<parallel>], iteration_bounds = array<i64: 1>, scalar_prefetch = 0 : i64, scratch_operands = 0 : i64, tpu.core_type = #tpu.core_type<tc>, window_params = [{transform_indices = @transform_0, window_bounds = array<i64: 32, 576>}, {pipeline_mode = #tpu.pipeline_mode<synchronous>, transform_indices = @transform_1, window_bounds = array<i64: 576, 64>}, {pipeline_mode = #tpu.pipeline_mode<synchronous>, transform_indices = @transform_2, window_bounds = array<i64: 1, 64>}, {transform_indices = @transform_3, window_bounds = array<i64: 32, 64>}]} {
    %c0 = arith.constant 0 : index
    %c0_0 = arith.constant 0 : index
    %0 = vector.load %arg1[%c0, %c0_0] : memref<32x576xbf16, #tpu.memory_space<vmem>>, vector<32x576xbf16>
    %c0_1 = arith.constant 0 : index
    %c0_2 = arith.constant 0 : index
    %1 = vector.load %arg2[%c0_1, %c0_2] : memref<576x64xbf16, #tpu.memory_space<vmem>>, vector<576x64xbf16>
    %cst = arith.constant dense<0.000000e+00> : vector<32x64xf32>
    %2 = tpu.matmul %0, %1, %cst {dimension_numbers = #tpu.dot_dimension_numbers<[1], [0], [0], [1], [0, 0, 1, 1], [], []>} : vector<32x576xbf16>, vector<576x64xbf16>, vector<32x64xf32> -> vector<32x64xf32>
    %c0_3 = arith.constant 0 : index
    %c0_4 = arith.constant 0 : index
    %3 = vector.load %arg3[%c0_3, %c0_4] : memref<1x64xf32, #tpu.memory_space<vmem>>, vector<1x64xf32>
    %4 = vector.broadcast %3 : vector<1x64xf32> to vector<32x64xf32>
    %5 = arith.addf %2, %4 : vector<32x64xf32>
    %cst_5 = arith.constant 0.000000e+00 : f32
    %6 = vector.broadcast %cst_5 : f32 to vector<32x64xf32>
    %7 = arith.cmpf oge, %5, %6 : vector<32x64xf32>
    %cst_6 = arith.constant 2.000000e-01 : f32
    %8 = vector.broadcast %cst_6 : f32 to vector<32x64xf32>
    %9 = arith.mulf %8, %5 : vector<32x64xf32>
    %10 = arith.select %7, %5, %9 : vector<32x64xi1>, vector<32x64xf32>
    %11 = arith.truncf %10 : vector<32x64xf32> to vector<32x64xbf16>
    %c0_7 = arith.constant 0 : index
    %c0_8 = arith.constant 0 : index
    %12 = vector.load %arg4[%c0_7, %c0_8] : memref<32x64xbf16, #tpu.memory_space<vmem>>, vector<32x64xbf16>
    tpu.vector_store %arg4[%c0_7, %c0_8], %11 {strides = array<i32>} : memref<32x64xbf16, #tpu.memory_space<vmem>>, vector<32x64xbf16>,
    return
  }
  func.func @transform_0(%arg0: i32) -> (i32, i32) {
    %c0_i32 = arith.constant 0 : i32
    %c0_i32_0 = arith.constant 0 : i32
    return %arg0, %c0_i32 : i32, i32
  }
  func.func @transform_1(%arg0: i32) -> (i32, i32) {
    %c0_i32 = arith.constant 0 : i32
    %c0_i32_0 = arith.constant 0 : i32
    %c0_i32_1 = arith.constant 0 : i32
    return %c0_i32, %c0_i32_0 : i32, i32
  }
  func.func @transform_2(%arg0: i32) -> (i32, i32) {
    %c0_i32 = arith.constant 0 : i32
    %c0_i32_0 = arith.constant 0 : i32
    %c0_i32_1 = arith.constant 0 : i32
    return %c0_i32, %c0_i32_0 : i32, i32
  }
  func.func @transform_3(%arg0: i32) -> (i32, i32) {
    %c0_i32 = arith.constant 0 : i32
    %c0_i32_0 = arith.constant 0 : i32
    return %arg0, %c0_i32 : i32, i32
  }
}

module attributes {stable_mosaic.version = 11 : i64} {
  func.func @_conv_ca_kernel(%arg0: i32, %arg1: i32, %arg2: memref<1x16x576xbf16, #tpu.memory_space<vmem>>, %arg3: memref<576x64xbf16, #tpu.memory_space<vmem>>, %arg4: memref<1x64xf32, #tpu.memory_space<vmem>>, %arg5: memref<64x4xf32, #tpu.memory_space<vmem>>, %arg6: memref<1x4xf32, #tpu.memory_space<vmem>>, %arg7: memref<4x64xf32, #tpu.memory_space<vmem>>, %arg8: memref<1x64xf32, #tpu.memory_space<vmem>>, %arg9: memref<1x16x64xbf16, #tpu.memory_space<vmem>>, %arg10: memref<1x1x64xf32, #tpu.memory_space<vmem>>) attributes {dimension_semantics = [#tpu.dimension_semantics<parallel>, #tpu.dimension_semantics<arbitrary>], iteration_bounds = array<i64: 2, 1>, scalar_prefetch = 0 : i64, scratch_operands = 0 : i64, tpu.core_type = #tpu.core_type<tc>, window_params = [{transform_indices = @transform_0, window_bounds = array<i64: 1, 16, 576>}, {pipeline_mode = #tpu.pipeline_mode<synchronous>, transform_indices = @transform_1, window_bounds = array<i64: 576, 64>}, {pipeline_mode = #tpu.pipeline_mode<synchronous>, transform_indices = @transform_2, window_bounds = array<i64: 1, 64>}, {pipeline_mode = #tpu.pipeline_mode<synchronous>, transform_indices = @transform_3, window_bounds = array<i64: 64, 4>}, {pipeline_mode = #tpu.pipeline_mode<synchronous>, transform_indices = @transform_4, window_bounds = array<i64: 1, 4>}, {pipeline_mode = #tpu.pipeline_mode<synchronous>, transform_indices = @transform_5, window_bounds = array<i64: 4, 64>}, {pipeline_mode = #tpu.pipeline_mode<synchronous>, transform_indices = @transform_6, window_bounds = array<i64: 1, 64>}, {transform_indices = @transform_7, window_bounds = array<i64: 1, 16, 64>}, {transform_indices = @transform_8, window_bounds = array<i64: 1, 1, 64>}]} {
    %c0_i32 = arith.constant 0 : i32
    %0 = arith.cmpi eq, %arg1, %c0_i32 : i32
    %1 = arith.extui %0 : i1 to i32
    %c0_i32_0 = arith.constant 0 : i32
    %2 = arith.cmpi ne, %1, %c0_i32_0 : i32
    scf.if %2 {
      %cst_21 = arith.constant 0.000000e+00 : f32
      %35 = vector.broadcast %cst_21 : f32 to vector<1x1x64xf32>
      %c0_22 = arith.constant 0 : index
      %c0_23 = arith.constant 0 : index
      %c0_24 = arith.constant 0 : index
      %36 = vector.load %arg10[%c0_22, %c0_23, %c0_24] : memref<1x1x64xf32, #tpu.memory_space<vmem>>, vector<1x1x64xf32>
      tpu.vector_store %arg10[%c0_22, %c0_23, %c0_24], %35 {strides = array<i32>} : memref<1x1x64xf32, #tpu.memory_space<vmem>>, vector<1x1x64xf32>,
    } else {
    }
    %c0 = arith.constant 0 : index
    %c0_1 = arith.constant 0 : index
    %c0_2 = arith.constant 0 : index
    %3 = vector.load %arg2[%c0, %c0_1, %c0_2] : memref<1x16x576xbf16, #tpu.memory_space<vmem>>, vector<1x16x576xbf16>
    %4 = vector.shape_cast %3 : vector<1x16x576xbf16> to vector<16x576xbf16>
    %c0_3 = arith.constant 0 : index
    %c0_4 = arith.constant 0 : index
    %5 = vector.load %arg3[%c0_3, %c0_4] : memref<576x64xbf16, #tpu.memory_space<vmem>>, vector<576x64xbf16>
    %cst = arith.constant dense<0.000000e+00> : vector<16x64xf32>
    %6 = tpu.matmul %4, %5, %cst {dimension_numbers = #tpu.dot_dimension_numbers<[1], [0], [0], [1], [0, 0, 1, 1], [], []>} : vector<16x576xbf16>, vector<576x64xbf16>, vector<16x64xf32> -> vector<16x64xf32>
    %c0_5 = arith.constant 0 : index
    %c0_6 = arith.constant 0 : index
    %7 = vector.load %arg4[%c0_5, %c0_6] : memref<1x64xf32, #tpu.memory_space<vmem>>, vector<1x64xf32>
    %8 = vector.broadcast %7 : vector<1x64xf32> to vector<16x64xf32>
    %9 = arith.addf %6, %8 : vector<16x64xf32>
    %10 = arith.truncf %9 : vector<16x64xf32> to vector<16x64xbf16>
    %c0_7 = arith.constant 0 : index
    %c0_8 = arith.constant 0 : index
    %c0_9 = arith.constant 0 : index
    %11 = vector.load %arg9[%c0_7, %c0_8, %c0_9] : memref<1x16x64xbf16, #tpu.memory_space<vmem>>, vector<1x16x64xbf16>
    %12 = vector.shape_cast %11 : vector<1x16x64xbf16> to vector<16x64xbf16>
    %13 = vector.shape_cast %10 : vector<16x64xbf16> to vector<1x16x64xbf16>
    tpu.vector_store %arg9[%c0_7, %c0_8, %c0_9], %13 {strides = array<i32>} : memref<1x16x64xbf16, #tpu.memory_space<vmem>>, vector<1x16x64xbf16>,
    %c16_i32 = arith.constant 16 : i32
    %14 = arith.muli %arg1, %c16_i32 : i32
    %15 = tpu.iota {dimensions = array<i32: 0>} : vector<16x1xi32>
    %16 = vector.broadcast %14 : i32 to vector<16x1xi32>
    %17 = arith.addi %16, %15 : vector<16x1xi32>
    %c16_i32_10 = arith.constant 16 : i32
    %18 = vector.broadcast %c16_i32_10 : i32 to vector<16x1xi32>
    %19 = arith.cmpi slt, %17, %18 : vector<16x1xi32>
    %cst_11 = arith.constant 0.000000e+00 : f32
    %20 = vector.shape_cast %19 : vector<16x1xi1> to vector<16x1xi1>
    %21 = vector.broadcast %20 : vector<16x1xi1> to vector<16x64xi1>
    %22 = vector.broadcast %cst_11 : f32 to vector<16x64xf32>
    %23 = arith.select %21, %9, %22 : vector<16x64xi1>, vector<16x64xf32>
    %c0_12 = arith.constant 0 : index
    %c0_13 = arith.constant 0 : index
    %c0_14 = arith.constant 0 : index
    %24 = vector.load %arg10[%c0_12, %c0_13, %c0_14] : memref<1x1x64xf32, #tpu.memory_space<vmem>>, vector<1x1x64xf32>
    %25 = vector.shape_cast %24 : vector<1x1x64xf32> to vector<1x64xf32>
    %cst_15 = arith.constant dense<0.000000e+00> : vector<64xf32>
    %26 = vector.multi_reduction <add>, %23, %cst_15 [0] : vector<16x64xf32> to vector<64xf32>
    %27 = vector.shape_cast %26 : vector<64xf32> to vector<1x64xf32>
    %28 = arith.addf %25, %27 : vector<1x64xf32>
    %c0_16 = arith.constant 0 : index
    %c0_17 = arith.constant 0 : index
    %c0_18 = arith.constant 0 : index
    %29 = vector.load %arg10[%c0_16, %c0_17, %c0_18] : memref<1x1x64xf32, #tpu.memory_space<vmem>>, vector<1x1x64xf32>
    %30 = vector.shape_cast %29 : vector<1x1x64xf32> to vector<1x64xf32>
    %31 = vector.shape_cast %28 : vector<1x64xf32> to vector<1x1x64xf32>
    tpu.vector_store %arg10[%c0_16, %c0_17, %c0_18], %31 {strides = array<i32>} : memref<1x1x64xf32, #tpu.memory_space<vmem>>, vector<1x1x64xf32>,
    %c0_i32_19 = arith.constant 0 : i32
    %32 = arith.cmpi eq, %arg1, %c0_i32_19 : i32
    %33 = arith.extui %32 : i1 to i32
    %c0_i32_20 = arith.constant 0 : i32
    %34 = arith.cmpi ne, %33, %c0_i32_20 : i32
    scf.if %34 {
      %c0_21 = arith.constant 0 : index
      %c0_22 = arith.constant 0 : index
      %c0_23 = arith.constant 0 : index
      %35 = vector.load %arg10[%c0_21, %c0_22, %c0_23] : memref<1x1x64xf32, #tpu.memory_space<vmem>>, vector<1x1x64xf32>
      %36 = vector.shape_cast %35 : vector<1x1x64xf32> to vector<1x64xf32>
      %cst_24 = arith.constant 6.250000e-02 : f32
      %37 = vector.broadcast %cst_24 : f32 to vector<1x64xf32>
      %38 = arith.mulf %36, %37 : vector<1x64xf32>
      %c0_25 = arith.constant 0 : index
      %c0_26 = arith.constant 0 : index
      %39 = vector.load %arg5[%c0_25, %c0_26] : memref<64x4xf32, #tpu.memory_space<vmem>>, vector<64x4xf32>
      %cst_27 = arith.constant dense<0.000000e+00> : vector<1x4xf32>
      %40 = tpu.matmul %38, %39, %cst_27 {dimension_numbers = #tpu.dot_dimension_numbers<[1], [0], [0], [1], [0, 0, 1, 1], [], []>} : vector<1x64xf32>, vector<64x4xf32>, vector<1x4xf32> -> vector<1x4xf32>
      %c0_28 = arith.constant 0 : index
      %c0_29 = arith.constant 0 : index
      %41 = vector.load %arg6[%c0_28, %c0_29] : memref<1x4xf32, #tpu.memory_space<vmem>>, vector<1x4xf32>
      %42 = arith.addf %40, %41 : vector<1x4xf32>
      %cst_30 = arith.constant 0.000000e+00 : f32
      %43 = vector.broadcast %cst_30 : f32 to vector<1x4xf32>
      %44 = arith.cmpf oge, %42, %43 : vector<1x4xf32>
      %cst_31 = arith.constant 2.000000e-01 : f32
      %45 = vector.broadcast %cst_31 : f32 to vector<1x4xf32>
      %46 = arith.mulf %45, %42 : vector<1x4xf32>
      %47 = arith.select %44, %42, %46 : vector<1x4xi1>, vector<1x4xf32>
      %c0_32 = arith.constant 0 : index
      %c0_33 = arith.constant 0 : index
      %48 = vector.load %arg7[%c0_32, %c0_33] : memref<4x64xf32, #tpu.memory_space<vmem>>, vector<4x64xf32>
      %cst_34 = arith.constant dense<0.000000e+00> : vector<1x64xf32>
      %49 = tpu.matmul %47, %48, %cst_34 {dimension_numbers = #tpu.dot_dimension_numbers<[1], [0], [0], [1], [0, 0, 1, 1], [], []>} : vector<1x4xf32>, vector<4x64xf32>, vector<1x64xf32> -> vector<1x64xf32>
      %c0_35 = arith.constant 0 : index
      %c0_36 = arith.constant 0 : index
      %50 = vector.load %arg8[%c0_35, %c0_36] : memref<1x64xf32, #tpu.memory_space<vmem>>, vector<1x64xf32>
      %51 = arith.addf %49, %50 : vector<1x64xf32>
      %cst_37 = arith.constant 0.000000e+00 : f32
      %52 = vector.broadcast %cst_37 : f32 to vector<1x64xf32>
      %53 = arith.subf %52, %51 : vector<1x64xf32>
      %54 = math.exp %53 : vector<1x64xf32>
      %cst_38 = arith.constant 1.000000e+00 : f32
      %55 = vector.broadcast %cst_38 : f32 to vector<1x64xf32>
      %56 = arith.addf %55, %54 : vector<1x64xf32>
      %57 = tpu.reciprocal %56 {approx = true} : vector<1x64xf32> -> vector<1x64xf32>
      %c0_39 = arith.constant 0 : index
      %c0_40 = arith.constant 0 : index
      %c0_41 = arith.constant 0 : index
      %58 = vector.load %arg10[%c0_39, %c0_40, %c0_41] : memref<1x1x64xf32, #tpu.memory_space<vmem>>, vector<1x1x64xf32>
      %59 = vector.shape_cast %58 : vector<1x1x64xf32> to vector<1x64xf32>
      %60 = vector.shape_cast %57 : vector<1x64xf32> to vector<1x1x64xf32>
      tpu.vector_store %arg10[%c0_39, %c0_40, %c0_41], %60 {strides = array<i32>} : memref<1x1x64xf32, #tpu.memory_space<vmem>>, vector<1x1x64xf32>,
    } else {
    }
    return
  }
  func.func @transform_0(%arg0: i32, %arg1: i32) -> (i32, i32, i32) {
    %c0_i32 = arith.constant 0 : i32
    %c0_i32_0 = arith.constant 0 : i32
    return %arg0, %arg1, %c0_i32 : i32, i32, i32
  }
  func.func @transform_1(%arg0: i32, %arg1: i32) -> (i32, i32) {
    %c0_i32 = arith.constant 0 : i32
    %c0_i32_0 = arith.constant 0 : i32
    %c0_i32_1 = arith.constant 0 : i32
    return %c0_i32, %c0_i32_0 : i32, i32
  }
  func.func @transform_2(%arg0: i32, %arg1: i32) -> (i32, i32) {
    %c0_i32 = arith.constant 0 : i32
    %c0_i32_0 = arith.constant 0 : i32
    %c0_i32_1 = arith.constant 0 : i32
    return %c0_i32, %c0_i32_0 : i32, i32
  }
  func.func @transform_3(%arg0: i32, %arg1: i32) -> (i32, i32) {
    %c0_i32 = arith.constant 0 : i32
    %c0_i32_0 = arith.constant 0 : i32
    %c0_i32_1 = arith.constant 0 : i32
    return %c0_i32, %c0_i32_0 : i32, i32
  }
  func.func @transform_4(%arg0: i32, %arg1: i32) -> (i32, i32) {
    %c0_i32 = arith.constant 0 : i32
    %c0_i32_0 = arith.constant 0 : i32
    %c0_i32_1 = arith.constant 0 : i32
    return %c0_i32, %c0_i32_0 : i32, i32
  }
  func.func @transform_5(%arg0: i32, %arg1: i32) -> (i32, i32) {
    %c0_i32 = arith.constant 0 : i32
    %c0_i32_0 = arith.constant 0 : i32
    %c0_i32_1 = arith.constant 0 : i32
    return %c0_i32, %c0_i32_0 : i32, i32
  }
  func.func @transform_6(%arg0: i32, %arg1: i32) -> (i32, i32) {
    %c0_i32 = arith.constant 0 : i32
    %c0_i32_0 = arith.constant 0 : i32
    %c0_i32_1 = arith.constant 0 : i32
    return %c0_i32, %c0_i32_0 : i32, i32
  }
  func.func @transform_7(%arg0: i32, %arg1: i32) -> (i32, i32, i32) {
    %c0_i32 = arith.constant 0 : i32
    %c0_i32_0 = arith.constant 0 : i32
    return %arg0, %arg1, %c0_i32 : i32, i32, i32
  }
  func.func @transform_8(%arg0: i32, %arg1: i32) -> (i32, i32, i32) {
    %c0_i32 = arith.constant 0 : i32
    %c0_i32_0 = arith.constant 0 : i32
    %c0_i32_1 = arith.constant 0 : i32
    return %arg0, %c0_i32, %c0_i32_0 : i32, i32, i32
  }
}

module attributes {stable_mosaic.version = 11 : i64} {
  func.func @_scale_residual_kernel(%arg0: i32, %arg1: i32, %arg2: memref<1x16x64xbf16, #tpu.memory_space<vmem>>, %arg3: memref<1x16x64xbf16, #tpu.memory_space<vmem>>, %arg4: memref<1x1x64xf32, #tpu.memory_space<vmem>>, %arg5: memref<1x16x64xbf16, #tpu.memory_space<vmem>>) attributes {dimension_semantics = [#tpu.dimension_semantics<parallel>, #tpu.dimension_semantics<parallel>], iteration_bounds = array<i64: 2, 1>, scalar_prefetch = 0 : i64, scratch_operands = 0 : i64, tpu.core_type = #tpu.core_type<tc>, window_params = [{transform_indices = @transform_0, window_bounds = array<i64: 1, 16, 64>}, {transform_indices = @transform_1, window_bounds = array<i64: 1, 16, 64>}, {transform_indices = @transform_2, window_bounds = array<i64: 1, 1, 64>}, {transform_indices = @transform_3, window_bounds = array<i64: 1, 16, 64>}]} {
    %c0 = arith.constant 0 : index
    %c0_0 = arith.constant 0 : index
    %c0_1 = arith.constant 0 : index
    %0 = vector.load %arg2[%c0, %c0_0, %c0_1] : memref<1x16x64xbf16, #tpu.memory_space<vmem>>, vector<1x16x64xbf16>
    %1 = vector.shape_cast %0 : vector<1x16x64xbf16> to vector<16x64xbf16>
    %2 = arith.extf %1 : vector<16x64xbf16> to vector<16x64xf32>
    %c0_2 = arith.constant 0 : index
    %c0_3 = arith.constant 0 : index
    %c0_4 = arith.constant 0 : index
    %3 = vector.load %arg3[%c0_2, %c0_3, %c0_4] : memref<1x16x64xbf16, #tpu.memory_space<vmem>>, vector<1x16x64xbf16>
    %4 = vector.shape_cast %3 : vector<1x16x64xbf16> to vector<16x64xbf16>
    %5 = arith.extf %4 : vector<16x64xbf16> to vector<16x64xf32>
    %c0_5 = arith.constant 0 : index
    %c0_6 = arith.constant 0 : index
    %c0_7 = arith.constant 0 : index
    %6 = vector.load %arg4[%c0_5, %c0_6, %c0_7] : memref<1x1x64xf32, #tpu.memory_space<vmem>>, vector<1x1x64xf32>
    %7 = vector.shape_cast %6 : vector<1x1x64xf32> to vector<1x64xf32>
    %8 = vector.broadcast %7 : vector<1x64xf32> to vector<16x64xf32>
    %9 = arith.mulf %2, %8 : vector<16x64xf32>
    %10 = arith.addf %9, %5 : vector<16x64xf32>
    %11 = arith.truncf %10 : vector<16x64xf32> to vector<16x64xbf16>
    %c0_8 = arith.constant 0 : index
    %c0_9 = arith.constant 0 : index
    %c0_10 = arith.constant 0 : index
    %12 = vector.load %arg5[%c0_8, %c0_9, %c0_10] : memref<1x16x64xbf16, #tpu.memory_space<vmem>>, vector<1x16x64xbf16>
    %13 = vector.shape_cast %12 : vector<1x16x64xbf16> to vector<16x64xbf16>
    %14 = vector.shape_cast %11 : vector<16x64xbf16> to vector<1x16x64xbf16>
    tpu.vector_store %arg5[%c0_8, %c0_9, %c0_10], %14 {strides = array<i32>} : memref<1x16x64xbf16, #tpu.memory_space<vmem>>, vector<1x16x64xbf16>,
    return
  }
  func.func @transform_0(%arg0: i32, %arg1: i32) -> (i32, i32, i32) {
    %c0_i32 = arith.constant 0 : i32
    %c0_i32_0 = arith.constant 0 : i32
    return %arg0, %arg1, %c0_i32 : i32, i32, i32
  }
  func.func @transform_1(%arg0: i32, %arg1: i32) -> (i32, i32, i32) {
    %c0_i32 = arith.constant 0 : i32
    %c0_i32_0 = arith.constant 0 : i32
    return %arg0, %arg1, %c0_i32 : i32, i32, i32
  }
  func.func @transform_2(%arg0: i32, %arg1: i32) -> (i32, i32, i32) {
    %c0_i32 = arith.constant 0 : i32
    %c0_i32_0 = arith.constant 0 : i32
    %c0_i32_1 = arith.constant 0 : i32
    return %arg0, %c0_i32, %c0_i32_0 : i32, i32, i32
  }
  func.func @transform_3(%arg0: i32, %arg1: i32) -> (i32, i32, i32) {
    %c0_i32 = arith.constant 0 : i32
    %c0_i32_0 = arith.constant 0 : i32
    return %arg0, %arg1, %c0_i32 : i32, i32, i32
  }
}

module attributes {stable_mosaic.version = 11 : i64} {
  func.func @_tail_head_kernel(%arg0: memref<2x576xf32, #tpu.memory_space<vmem>>, %arg1: memref<576x3xf32, #tpu.memory_space<vmem>>, %arg2: memref<1x3xf32, #tpu.memory_space<vmem>>, %arg3: memref<2x3xf32, #tpu.memory_space<vmem>>) attributes {dimension_semantics = [], scalar_prefetch = 0 : i64, scratch_operands = 0 : i64, tpu.core_type = #tpu.core_type<tc>} {
    %c0 = arith.constant 0 : index
    %c0_0 = arith.constant 0 : index
    %0 = vector.load %arg0[%c0, %c0_0] : memref<2x576xf32, #tpu.memory_space<vmem>>, vector<2x576xf32>
    %c0_1 = arith.constant 0 : index
    %c0_2 = arith.constant 0 : index
    %1 = vector.load %arg1[%c0_1, %c0_2] : memref<576x3xf32, #tpu.memory_space<vmem>>, vector<576x3xf32>
    %cst = arith.constant dense<0.000000e+00> : vector<2x3xf32>
    %2 = tpu.matmul %0, %1, %cst {dimension_numbers = #tpu.dot_dimension_numbers<[1], [0], [0], [1], [0, 0, 1, 1], [], []>} : vector<2x576xf32>, vector<576x3xf32>, vector<2x3xf32> -> vector<2x3xf32>
    %c0_3 = arith.constant 0 : index
    %c0_4 = arith.constant 0 : index
    %3 = vector.load %arg2[%c0_3, %c0_4] : memref<1x3xf32, #tpu.memory_space<vmem>>, vector<1x3xf32>
    %4 = vector.broadcast %3 : vector<1x3xf32> to vector<2x3xf32>
    %5 = arith.addf %2, %4 : vector<2x3xf32>
    %cst_5 = arith.constant -9.21034049 : f32
    %cst_6 = arith.constant 4.60517025 : f32
    %6 = vector.broadcast %cst_5 : f32 to vector<2x3xf32>
    %7 = arith.maximumf %6, %5 : vector<2x3xf32>
    %8 = vector.broadcast %cst_6 : f32 to vector<2x3xf32>
    %9 = arith.minimumf %8, %7 : vector<2x3xf32>
    %10 = math.exp %9 : vector<2x3xf32>
    %11 = math.tanh %5 : vector<2x3xf32>
    %12 = tpu.iota {dimensions = array<i32: 1>} : vector<2x3xi32>
    %c2_i32 = arith.constant 2 : i32
    %13 = vector.broadcast %c2_i32 : i32 to vector<2x3xi32>
    %14 = arith.cmpi slt, %12, %13 : vector<2x3xi32>
    %15 = arith.select %14, %10, %11 : vector<2x3xi1>, vector<2x3xf32>
    %c0_7 = arith.constant 0 : index
    %c0_8 = arith.constant 0 : index
    %16 = vector.load %arg3[%c0_7, %c0_8] : memref<2x3xf32, #tpu.memory_space<vmem>>, vector<2x3xf32>
    tpu.vector_store %arg3[%c0_7, %c0_8], %15 {strides = array<i32>} : memref<2x3xf32, #tpu.memory_space<vmem>>, vector<2x3xf32>,
    return
  }
}

</mosaic_0001>

<bundles_post_ra>
// kernel: kernelnet_forward.26
= control target key start
LH: loop header
LB: loop body
LE: loop exit
PB: predicated region body
PF: predicated region fallthrough
CT: control target
= control target key end

     0   :  { %vm165_vm0 = vcmask 1040384   ;;  %vm166_vm1 = vcmask 1041408   ;;  %v343_v1 = vmov 65535   ;;  %vm158_vm2 = vcmask 941056   ;;  %s431_s1 = inlined_call_operand.vmem [shape: bf16[243,64], index: 1, kind: input, shape index: {}]   ;;  %s432_s0 = inlined_call_operand.vmem [shape: bf16[32,243], index: 0, kind: input, shape index: {}]   ;;  %s433_s2 = inlined_call_operand.vmem [shape: bf16[32,64], index: 2, kind: output, shape index: {}]  }
   0x1   :  { %v321_v0 = vld [vmem:[%s431_s1 + $0x78] ss:$0 sps:$4 sm:$0x33]   ;;  %v167_v2 = vsel %vm165_vm0, 4294967295, %v343_v1  ;;  %v323_v6 = vld [vmem:[%s431_s1 + $0x70] sm:$0xff]   ;;  %v325_v8 = vld [vmem:[%s431_s1 + $0x68] sm:$0xff]  }
   0x2   :  { %v168_v3 = vsel %vm166_vm1, %v167_v2, 0  ;;  %v322_v4 = vld [vmem:[%s431_s1 + $0x38] sm:$0xff]   ;;  %v324_v7 = vld [vmem:[%s431_s1 + $0x30] sm:$0xff]   ;;  %v326_v9 = vld [vmem:[%s431_s1 + $0x28] sm:$0xff]   ;;  %vm237_vm3 = vcmask 519168  }
   0x3   :  { %v170_v5 = vand.u32 %v321_v0, %v168_v3  ;;  %v327_v10 = vld [vmem:[%s431_s1 + $0x60] sm:$0xff]   ;;  %v329_v12 = vld [vmem:[%s431_s1 + $0x58] sm:$0xff]   ;;  %v331_v15 = vld [vmem:[%s431_s1 + $0x50] sm:$0xff]  }
   0x4   :  { %v328_v11 = vld [vmem:[%s431_s1 + $0x20] sm:$0xff]   ;;  %v330_v13 = vld [vmem:[%s431_s1 + $0x18] sm:$0xff]   ;;  %v332_v17 = vld [vmem:[%s431_s1 + $0x10] sm:$0xff]  }
   0x5   :  { %276 = vmatprep.subr.bf16.mxu0 %v170_v5  ;;  %304 = vmatprep.subr.bf16.mxu1 %v170_v5  ;;  %v339_v14 = vld [vmem:[%s432_s0 + $0x4] ss:$8 sps:$4 sm:$0xff]   ;;  %v342_v16 = vld [vmem:[%s432_s0 + $0x14] ss:$8 sps:$4 sm:$0xff]   ;;  %v337_v22 = vld [vmem:[%s432_s0] ss:$8 sps:$4 sm:$0xff]  }
   0x6   :  { %277 = vmatpush3.bf16.msra.mxu0 %v322_v4  ;;  %312 = vmatpush3.bf16.msra.mxu1 %v322_v4  ;;  %v333_v18 = vld [vmem:[%s431_s1 + $0x48] sm:$0xff]   ;;  %v335_v20 = vld [vmem:[%s431_s1 + $0x40] sm:$0xff]   ;;  %v340_v23 = vld [vmem:[%s432_s0 + $0x10] ss:$8 sps:$4 sm:$0xff]  }
   0x7   :  { %278 = vmatprep.subr.bf16.mxu0 %v323_v6  ;;  %305 = vmatprep.subr.bf16.mxu1 %v323_v6  ;;  %v334_v19 = vld [vmem:[%s431_s1 + $0x8] sm:$0xff]   ;;  %v336_v21 = vld [vmem:[%s431_s1] sm:$0xff]  }
   0x8   :  { %266 = vmatprep.mubr.msk.bf16.mxu0 %vm158_vm2, %v339_v14  ;;  %267 = vmatprep.mubr.msk.bf16.mxu1 %vm158_vm2, %v342_v16 }
   0xa   :  { %279 = vmatpush3.bf16.msra.mxu0 %v324_v7  ;;  %313 = vmatpush3.bf16.msra.mxu1 %v324_v7 }
   0xb   :  { %280 = vmatprep.subr.bf16.mxu0 %v325_v8  ;;  %306 = vmatprep.subr.bf16.mxu1 %v325_v8 }
   0xe   :  { %281 = vmatpush3.bf16.msra.mxu0 %v326_v9  ;;  %314 = vmatpush3.bf16.msra.mxu1 %v326_v9 }
   0xf   :  { %282 = vmatprep.subr.bf16.mxu0 %v327_v10  ;;  %307 = vmatprep.subr.bf16.mxu1 %v327_v10 }
  0x12   :  { %283 = vmatpush3.bf16.msra.mxu0 %v328_v11  ;;  %315 = vmatpush3.bf16.msra.mxu1 %v328_v11 }
  0x13   :  { %284 = vmatprep.subr.bf16.mxu0 %v329_v12  ;;  %308 = vmatprep.subr.bf16.mxu1 %v329_v12 }
  0x16   :  { %285 = vmatpush3.bf16.msra.mxu0 %v330_v13  ;;  %316 = vmatpush3.bf16.msra.mxu1 %v330_v13 }
  0x17   :  { %286 = vmatprep.subr.bf16.mxu0 %v331_v15  ;;  %309 = vmatprep.subr.bf16.mxu1 %v331_v15 }
  0x1a   :  { %287 = vmatpush3.bf16.msra.mxu0 %v332_v17  ;;  %317 = vmatpush3.bf16.msra.mxu1 %v332_v17 }
  0x1b   :  { %288 = vmatprep.subr.bf16.mxu0 %v333_v18  ;;  %310 = vmatprep.subr.bf16.mxu1 %v333_v18 }
  0x1e   :  { %289 = vmatpush3.bf16.msra.mxu0 %v334_v19  ;;  %318 = vmatpush3.bf16.msra.mxu1 %v334_v19 }
  0x1f   :  { %290 = vmatprep.subr.bf16.mxu0 %v335_v20  ;;  %311 = vmatprep.subr.bf16.mxu1 %v335_v20 }
  0x22   :  { %291 = vmatpush3.bf16.msra.mxu0 %v336_v21  ;;  %319 = vmatpush3.bf16.msra.mxu1 %v336_v21 }
  0x25   :  { %205 = vmatmul.mubr.bf16.vlgmr.msra.gmra.mxu0 %v337_v22  ;;  %213 = vmatmul.mubr.bf16.vlgmr.msra.gmra.mxu1 %v340_v23 }
  0xe5   :  { %v292_v24 = vpop.f32.mrf.mxu0  ;;  %v298_v25 = vpop.f32.mrf.mxu1 }
  0xe7   :  { %v293_v26 = vpop.f32.mrf.mxu0  ;;  %v299_v27 = vpop.f32.mrf.mxu1 }
  0xe8   :  { %v294_v28 = vadd.f32 %v293_v26, %v292_v24  ;;  %v300_v29 = vadd.f32 %v299_v27, %v298_v25 }
  0xe9   :  { %v295_v30 = vpop.f32.mrf.mxu0  ;;  %v301_v31 = vpop.f32.mrf.mxu1 }
  0xea   :  { %v272_v32 = vpack.c.bf16 %v294_v28, %v294_v28  ;;  %v274_v33 = vpack.c.bf16 %v300_v29, %v300_v29 }
  0xeb   :  { %v296_v34 = vpop.f32.mrf.mxu0  ;;  %v302_v35 = vpop.f32.mrf.mxu1 }
  0xec   :  { %238 = vst.msk [vmem:[%s433_s2] sm:$0xf] %vm237_vm3, %v272_v32  ;;  %240 = vst.msk [vmem:[%s433_s2 + $0x8] sm:$0xf] %vm237_vm3, %v274_v33  ;;  %v297_v36 = vadd.f32 %v296_v34, %v295_v30  ;;  %v303_v37 = vadd.f32 %v302_v35, %v301_v31 }
  0xee   :  { %v273_v38 = vpack.c.bf16 %v297_v36, %v297_v36  ;;  %v275_v39 = vpack.c.bf16 %v303_v37, %v303_v37 }
  0xf0   :  { %239 = vst.msk [vmem:[%s433_s2 + $0x4] sm:$0xf] %vm237_vm3, %v273_v38  ;;  %241 = vst.msk [vmem:[%s433_s2 + $0xc] sm:$0xf] %vm237_vm3, %v275_v39 }

// kernel: kernelnet_forward.27
= control target key start
LH: loop header
LB: loop body
LE: loop exit
PB: predicated region body
PF: predicated region fallthrough
CT: control target
= control target key end

     0   :  { %vm372_vm0 = vcmask 523264   ;;  %vm554_vm2 = vcmask 519168   ;;  %s921_s1 = inlined_call_operand.vmem [shape: bf16[576,64], index: 1, kind: input, shape index: {}]   ;;  %s922_s0 = inlined_call_operand.vmem [shape: bf16[32,576], index: 0, kind: input, shape index: {}]   ;;  %s923_s2 = inlined_call_operand.vmem [shape: f32[1,64], index: 2, kind: input, shape index: {}]   ;;  %s924_s3 = inlined_call_operand.vmem [shape: bf16[32,64], index: 3, kind: output, shape index: {}]  }
   0x1   :  { %v694_v0 = vld [vmem:[%s921_s1 + $0x78] sm:$0xff]   ;;  %v698_v4 = vld [vmem:[%s921_s1 + $0x70] sm:$0xff]   ;;  %v702_v8 = vld [vmem:[%s921_s1 + $0x68] sm:$0xff]  }
   0x2   :  { %v695_v1 = vld [vmem:[%s921_s1 + $0xf8] sm:$0xff]   ;;  %620 = vmatprep.subr.bf16.mxu0 %v694_v0  ;;  %v699_v5 = vld [vmem:[%s921_s1 + $0xf0] sm:$0xff]   ;;  %v703_v9 = vld [vmem:[%s921_s1 + $0xe8] sm:$0xff]  }
   0x3   :  { %v696_v2 = vld [vmem:[%s921_s1 + $0x38] sm:$0xff]   ;;  %648 = vmatprep.subr.bf16.mxu1 %v695_v1  ;;  %v700_v6 = vld [vmem:[%s921_s1 + $0x30] sm:$0xff]   ;;  %v704_v10 = vld [vmem:[%s921_s1 + $0x28] sm:$0xff]  }
   0x4   :  { %v697_v3 = vld [vmem:[%s921_s1 + $0xb8] sm:$0xff]   ;;  %621 = vmatpush3.bf16.msra.mxu0 %v696_v2  ;;  %v701_v7 = vld [vmem:[%s921_s1 + $0xb0] sm:$0xff]   ;;  %v705_v11 = vld [vmem:[%s921_s1 + $0xa8] sm:$0xff]  }
   0x5   :  { %649 = vmatpush3.bf16.msra.mxu1 %v697_v3  ;;  %622 = vmatprep.subr.bf16.mxu0 %v698_v4  ;;  %v706_v12 = vld [vmem:[%s921_s1 + $0x60] sm:$0xff]   ;;  %v710_v16 = vld [vmem:[%s921_s1 + $0x58] sm:$0xff]   ;;  %v714_v20 = vld [vmem:[%s921_s1 + $0x50] sm:$0xff]  }
   0x6   :  { %650 = vmatprep.subr.bf16.mxu1 %v699_v5  ;;  %v707_v13 = vld [vmem:[%s921_s1 + $0xe0] sm:$0xff]   ;;  %v711_v17 = vld [vmem:[%s921_s1 + $0xd8] sm:$0xff]   ;;  %v715_v21 = vld [vmem:[%s921_s1 + $0xd0] sm:$0xff]  }
   0x7   :  { %v708_v14 = vld [vmem:[%s921_s1 + $0x20] sm:$0xff]   ;;  %v712_v18 = vld [vmem:[%s921_s1 + $0x18] sm:$0xff]   ;;  %v716_v22 = vld [vmem:[%s921_s1 + $0x10] sm:$0xff]  }
   0x8   :  { %623 = vmatpush3.bf16.msra.mxu0 %v700_v6  ;;  %v709_v15 = vld [vmem:[%s921_s1 + $0xa0] sm:$0xff]   ;;  %v713_v19 = vld [vmem:[%s921_s1 + $0x98] sm:$0xff]   ;;  %v717_v23 = vld [vmem:[%s921_s1 + $0x90] sm:$0xff]  }
   0x9   :  { %651 = vmatpush3.bf16.msra.mxu1 %v701_v7  ;;  %624 = vmatprep.subr.bf16.mxu0 %v702_v8  ;;  %v718_v24 = vld [vmem:[%s921_s1 + $0x48] sm:$0xff]   ;;  %v722_v28 = vld [vmem:[%s921_s1 + $0x40] sm:$0xff]   ;;  %v732_v36 = vld [vmem:[%s921_s1 + $0x118] sm:$0xff]  }
   0xa   :  { %652 = vmatprep.subr.bf16.mxu1 %v703_v9  ;;  %v719_v25 = vld [vmem:[%s921_s1 + $0xc8] sm:$0xff]   ;;  %v723_v29 = vld [vmem:[%s921_s1 + $0xc0] sm:$0xff]   ;;  %v733_v37 = vld [vmem:[%s921_s1 + $0x110] sm:$0xff]  }
   0xb   :  { %v720_v26 = vld [vmem:[%s921_s1 + $0x8] sm:$0xff]   ;;  %v724_v30 = vld [vmem:[%s921_s1] sm:$0xff]  }
   0xc   :  { %625 = vmatpush3.bf16.msra.mxu0 %v704_v10  ;;  %v721_v27 = vld [vmem:[%s921_s1 + $0x88] sm:$0xff]   ;;  %v725_v31 = vld [vmem:[%s921_s1 + $0x80] sm:$0xff]  }
   0xd   :  { %653 = vmatpush3.bf16.msra.mxu1 %v705_v11  ;;  %626 = vmatprep.subr.bf16.mxu0 %v706_v12  ;;  %v726_v32 = vld [vmem:[%s922_s0] ss:$20 sps:$4 sm:$0xff]   ;;  %v728_v33 = vld [vmem:[%s922_s0 + $0x4] ss:$20 sps:$4 sm:$0xff]   ;;  %v729_v34 = vld [vmem:[%s922_s0 + $0x8] ss:$20 sps:$4 sm:$0xff]  }
   0xe   :  { %654 = vmatprep.subr.bf16.mxu1 %v707_v13  ;;  %v731_v35 = vld [vmem:[%s922_s0 + $0xc] ss:$20 sps:$4 sm:$0xff]   ;;  %411 = vmatprep.mubr.bf16.mxu0 %v728_v33  ;;  %v736_v39 = vld [vmem:[%s922_s0 + $0x34] ss:$20 sps:$4 sm:$0xff]   ;;  %v739_v42 = vld [vmem:[%s922_s0 + $0x30] ss:$20 sps:$4 sm:$0xff]  }
   0xf   :  { %460 = vmatprep.mubr.bf16.mxu1 %v731_v35  ;;  %v734_v38 = vld [vmem:[%s922_s0 + $0x2c] ss:$20 sps:$4 sm:$0xff]   ;;  %v738_v40 = vld [vmem:[%s922_s0 + $0x28] ss:$20 sps:$4 sm:$0xff]   ;;  %v742_v43 = vld [vmem:[%s922_s0 + $0x10] ss:$20 sps:$4 sm:$0xff]  }
  0x10   :  { %627 = vmatpush3.bf16.msra.mxu0 %v708_v14  ;;  %v740_v41 = vld [vmem:[%s921_s1 + $0x108] sm:$0xff]   ;;  %v741_v44 = vld [vmem:[%s921_s1 + $0x100] sm:$0xff]  }
  0x11   :  { %655 = vmatpush3.bf16.msra.mxu1 %v709_v15  ;;  %628 = vmatprep.subr.bf16.mxu0 %v710_v16  ;;  %v743_v45 = vld [vmem:[%s922_s0 + $0x38] ss:$20 sps:$4 sm:$0xff]   ;;  %v563_v58 = vld [vmem:[%s923_s2] ss:$0 sm:$0xff] }
  0x12   :  { %656 = vmatprep.subr.bf16.mxu1 %v711_v17 }
  0x14   :  { %629 = vmatpush3.bf16.msra.mxu0 %v712_v18 }
  0x15   :  { %657 = vmatpush3.bf16.msra.mxu1 %v713_v19  ;;  %630 = vmatprep.subr.bf16.mxu0 %v714_v20 }
  0x16   :  { %658 = vmatprep.subr.bf16.mxu1 %v715_v21 }
  0x18   :  { %631 = vmatpush3.bf16.msra.mxu0 %v716_v22 }
  0x19   :  { %659 = vmatpush3.bf16.msra.mxu1 %v717_v23  ;;  %632 = vmatprep.subr.bf16.mxu0 %v718_v24 }
  0x1a   :  { %660 = vmatprep.subr.bf16.mxu1 %v719_v25 }
  0x1c   :  { %633 = vmatpush3.bf16.msra.mxu0 %v720_v26 }
  0x1d   :  { %661 = vmatpush3.bf16.msra.mxu1 %v721_v27  ;;  %634 = vmatprep.subr.bf16.mxu0 %v722_v28 }
  0x1e   :  { %662 = vmatprep.subr.bf16.mxu1 %v723_v29 }
  0x20   :  { %635 = vmatpush3.bf16.msra.mxu0 %v724_v30 }
  0x21   :  { %663 = vmatpush3.bf16.msra.mxu1 %v725_v31  ;;  %682 = vmatprep.subr.bf16.mxu0 %v732_v36 }
  0x23   :  { %412 = vmatmul.mubr.bf16.vlgmr.msra.gmra.mxu0 %v726_v32 }
  0x24   :  { %461 = vmatmul.mubr.bf16.vlgmr.msra.gmra.mxu1 %v729_v34  ;;  %683 = vmatpush3.bf16.msra.mxu0 %v732_v36 }
  0x25   :  { %684 = vmatprep.subr.bf16.mxu0 %v733_v37  ;;  %419 = vmatprep.mubr.bf16.mxu0 %v734_v38 }
  0x26   :  { %468 = vmatprep.mubr.bf16.mxu1 %v736_v39 }
  0x28   :  { %685 = vmatpush3.bf16.msra.mxu0 %v733_v37 }
  0x29   :  { %686 = vmatprep.subr.bf16.mxu0 %v740_v41 }
  0x2b   :  { %420 = vmatmul.mubr.bf16.gmra.mxu0 %v738_v40 }
  0x2c   :  { %469 = vmatmul.mubr.bf16.gmra.mxu1 %v739_v42  ;;  %690 = vmatprep.mubr.msk.bf16.mxu0 %vm372_vm0, %v742_v43 }
  0x2d   :  { %687 = vmatpush3.bf16.msra.mxu0 %v740_v41 }
  0x2e   :  { %688 = vmatprep.subr.bf16.mxu0 %v741_v44 }
  0x31   :  { %689 = vmatpush3.bf16.msra.mxu0 %v741_v44 }
  0x34   :  { %691 = vmatmul.mubr.msk.bf16.vlgmr.msra.gmra.mxu0 %vm372_vm0, %v743_v45 }
  0xe3   :  { %v636_v46 = vpop.f32.mrf.mxu0 }
  0xe4   :  { %v664_v47 = vpop.f32.mrf.mxu1 }
  0xe5   :  { %v637_v48 = vpop.f32.mrf.mxu0 }
  0xe6   :  { %v665_v49 = vpop.f32.mrf.mxu1  ;;  %v638_v56 = vadd.f32 %v637_v48, %v636_v46 }
  0xe7   :  { %v639_v50 = vpop.f32.mrf.mxu0  ;;  %v666_v3 = vadd.f32 %v665_v49, %v664_v47 }
  0xe8   :  { %v667_v51 = vpop.f32.mrf.mxu1  ;;  %v414_v2 = vadd.f32 %v638_v56, %v563_v58 }
  0xe9   :  { %v640_v52 = vpop.f32.mrf.mxu0 }
  0xea   :  { %v668_v53 = vpop.f32.mrf.mxu1  ;;  %v641_v63 = vadd.f32 %v640_v52, %v639_v50  ;;  %v463_v13 = vadd.f32 %v666_v3, %v414_v2 }
  0xeb   :  { %v642_v54 = vpop.f32.mrf.mxu0  ;;  %v669_v14 = vadd.f32 %v668_v53, %v667_v51 }
  0xec   :  { %v670_v55 = vpop.f32.mrf.mxu1  ;;  %v417_v8 = vadd.f32 %v641_v63, %v563_v58 }
  0xed   :  { %v643_v57 = vpop.f32.mrf.mxu0 }
  0xee   :  { %v644_v59 = vadd.f32 %v643_v57, %v642_v54  ;;  %v671_v60 = vpop.f32.mrf.mxu1  ;;  %v466_v20 = vadd.f32 %v669_v14, %v417_v8 }
  0xef   :  { %v672_v61 = vadd.f32 %v671_v60, %v670_v55  ;;  %v645_v62 = vpop.f32.mrf.mxu0 }
  0xf0   :  { %v422_v0 = vadd.f32 %v644_v59, %v563_v58  ;;  %v673_v1 = vpop.f32.mrf.mxu1 }
  0xf1   :  { %v646_v4 = vpop.f32.mrf.mxu0 }
  0xf2   :  { %v647_v5 = vadd.f32 %v646_v4, %v645_v62  ;;  %v674_v6 = vpop.f32.mrf.mxu1  ;;  %v471_v7 = vadd.f32 %v672_v61, %v422_v0 }
  0xf3   :  { %v675_v10 = vadd.f32 %v674_v6, %v673_v1 }
  0xf4   :  { %v425_v9 = vadd.f32 %v647_v5, %v563_v58  ;;  %v692_v11 = vpop.f32.mrf.mxu0 }
  0xf5   :  { %v520_v12 = vadd.f32 %v692_v11, %v471_v7 }
  0xf6   :  { %v511_v15 = vpop.f32.mrf.mxu0  ;;  %v474_v16 = vadd.f32 %v675_v10, %v425_v9 }
  0xf7   :  { %vm528_vm1 = vcmp.ge.f32.partialorder %v520_v12, 0.0  ;;  %v532_v17 = vmul.f32 0.2, %v520_v12  ;;  %v512_v18 = vadd.f32 %v511_v15, %v463_v13 }
  0xf8   :  { %v693_v19 = vpop.f32.mrf.mxu0 }
  0xf9   :  { %v536_v21 = vsel %vm528_vm1, %v520_v12, %v532_v17  ;;  %vm526_vm3 = vcmp.ge.f32.partialorder %v512_v18, 0.0  ;;  %v530_v22 = vmul.f32 0.2, %v512_v18  ;;  %v523_v23 = vadd.f32 %v693_v19, %v474_v16 }
  0xfa   :  { %v618_v24 = vpack.c.bf16 %v536_v21, %v536_v21  ;;  %v514_v25 = vpop.f32.mrf.mxu0 }
  0xfb   :  { %v534_v26 = vsel %vm526_vm3, %v512_v18, %v530_v22  ;;  %vm529_vm4 = vcmp.ge.f32.partialorder %v523_v23, 0.0  ;;  %v533_v27 = vmul.f32 0.2, %v523_v23  ;;  %v515_v28 = vadd.f32 %v514_v25, %v466_v20 }
  0xfc   :  { %557 = vst.msk [vmem:[%s924_s3 + $0x8] sm:$0xf] %vm554_vm2, %v618_v24  ;;  %v616_v29 = vpack.c.bf16 %v534_v26, %v534_v26 }
  0xfd   :  { %v537_v30 = vsel %vm529_vm4, %v523_v23, %v533_v27  ;;  %vm527_vm5 = vcmp.ge.f32.partialorder %v515_v28, 0.0  ;;  %v531_v31 = vmul.f32 0.2, %v515_v28 }
  0xfe   :  { %555 = vst.msk [vmem:[%s924_s3] sm:$0xf] %vm554_vm2, %v616_v29  ;;  %v619_v32 = vpack.c.bf16 %v537_v30, %v537_v30 }
  0xff   :  { %v535_v33 = vsel %vm527_vm5, %v515_v28, %v531_v31 }
 0x100   :  { %558 = vst.msk [vmem:[%s924_s3 + $0xc] sm:$0xf] %vm554_vm2, %v619_v32  ;;  %v617_v34 = vpack.c.bf16 %v535_v33, %v535_v33 }
 0x102   :  { %556 = vst.msk [vmem:[%s924_s3 + $0x4] sm:$0xf] %vm554_vm2, %v617_v34 }

// kernel: kernelnet_forward.29
= control target key start
LH: loop header
LB: loop body
LE: loop exit
PB: predicated region body
PF: predicated region fallthrough
CT: control target
= control target key end

     0   :  { %s501_s12 = smov 0   ;;  %s503_s13 = smov 0   ;;  %s540_s0 = inlined_call_operand.vmem [shape: bf16[2,16,64], index: 0, kind: input, shape index: {}]   ;;  %s541_s1 = inlined_call_operand.vmem [shape: bf16[2,16,64], index: 1, kind: input, shape index: {}]   ;;  %s542_s2 = inlined_call_operand.vmem [shape: f32[2,1,64], index: 2, kind: input, shape index: {}]   ;;  %s543_s3 = inlined_call_operand.vmem [shape: bf16[2,16,64], index: 3, kind: output, shape index: {}]  }
   0x1   :  { %s505_s14 = smov 0  }
   0x2 LB: > { %s25_s15 = sadd.s32 1, %s475_s13  ;;  %p408_p0 = scmp.ge.s32.totalorder %s479_s14, 1  ;;  %s479_s14 = sphi %s505_s14, %s13_s14   ;;  %s475_s13 = sphi %s503_s13, %s545_s13   ;;  %s471_s12 = sphi %s501_s12, %s544_s12  }
   0x3   : > { %p27_p1 = scmp.ge.s32.totalorder %s25_s15, 2  ;;  %p183_p2 = scmp.lt.s32.totalorder %s479_s14, 3 }
   0x5   : > { %s547_s15 = smov (%p27_p1, %s25_s15), 0  ;;  %p184_p3 = pnand %p408_p0, %p183_p2 }
   0x6   : > { %p228_p4 = scmp.lt.s32.totalorder (!%p184_p3), %s471_s12, 1 }
   0x7   : > { %187 = sbr.rel (%p184_p3) target bundleno = 25 (0x19), region = 32 }
   0xc   : > { %s549_s12 = smov (!%p228_p4, %s471_s12), 1  ;;  %vm287_vm0 = vcmask 519168  }
   0xd   : > { %s420_s16 = sshll.u32 %s549_s12, 3  ;;  %s249_s19 = scalar_lea.vmem %s542_s2, %s549_s12 }
   0xe   : > { %s235_s22 = scalar_lea.vmem %s540_s0, %s420_s16  ;;  %s245_s25 = scalar_lea.vmem %s541_s1, %s420_s16  ;;  %v415_v2 = vld [vmem:[%s249_s19] ss:$0 sm:$0xff] }
   0xf   : > { %v426_v0 = vld [vmem:[%s235_s22] sm:$0xff]   ;;  %s258_s28 = scalar_lea.vmem %s543_s3, %s420_s16 }
  0x10   : > { %v430_v1 = vld [vmem:[%s245_s25] sm:$0xff]   ;;  %v427_v3 = vunpack.c.l.bf16 %v426_v0  ;;  %v428_v4 = vunpack.c.h.bf16 %v426_v0 }
  0x11   : > { %v431_v5 = vunpack.c.l.bf16 %v430_v1  ;;  %v432_v6 = vunpack.c.h.bf16 %v430_v1 }
  0x12   : > { %v275_v7 = vmul.f32 %v427_v3, %v415_v2  ;;  %v276_v8 = vmul.f32 %v428_v4, %v415_v2 }
  0x14   : > { %v277_v9 = vadd.f32 %v431_v5, %v275_v7  ;;  %v278_v10 = vadd.f32 %v432_v6, %v276_v8 }
  0x16   : > { %v423_v11 = vpack.c.bf16 %v277_v9, %v277_v9  ;;  %v424_v12 = vpack.c.bf16 %v278_v10, %v278_v10 }
  0x18   : > { %288 = vst.msk [vmem:[%s258_s28] sm:$0xf] %vm287_vm0, %v423_v11  ;;  %289 = vst.msk [vmem:[%s258_s28 + $0x4] sm:$0xf] %vm287_vm0, %v424_v12 }
  0x19 PF: > { %s13_s14 = sadd.s32 1, %s479_s14   ;;  %s544_s12 = smov %s475_s13 }
  0x1a   : > { %p10_p5 = scmp.ge.s32.totalorder %s13_s14, 4   ;;  %s545_s13 = smov %s547_s15 }
  0x1c   :  { %12 = sbr.rel (!%p10_p5) target bundleno = 2 (0x2), region = 68 }

// kernel: kernelnet_forward.28
= control target key start
LH: loop header
LB: loop body
LE: loop exit
PB: predicated region body
PF: predicated region fallthrough
CT: control target
= control target key end

     0   :  { %s1449_s27 = smov 0   ;;  %s1451_s28 = smov 0   ;;  %s1675_s0 = inlined_call_operand.vmem [shape: bf16[2,16,576], index: 0, kind: input, shape index: {}]   ;;  %s1676_s1 = inlined_call_operand.vmem [shape: bf16[576,64], index: 1, kind: input, shape index: {}]   ;;  %s1677_s2 = inlined_call_operand.vmem [shape: f32[1,64], index: 2, kind: input, shape index: {}]   ;;  %s1678_s3 = inlined_call_operand.vmem [shape: f32[64,4], index: 3, kind: input, shape index: {}]   ;;  %s1679_s4 = inlined_call_operand.vmem [shape: f32[1,4], index: 4, kind: input, shape index: {}]   ;;  %s1680_s5 = inlined_call_operand.vmem [shape: f32[4,64], index: 5, kind: input, shape index: {}]   ;;  %s1681_s6 = inlined_call_operand.vmem [shape: f32[1,64], index: 6, kind: input, shape index: {}]   ;;  %s1682_s7 = inlined_call_operand.vmem [shape: bf16[2,16,64], index: 7, kind: output, shape index: {0}]   ;;  %s1683_s8 = inlined_call_operand.vmem [shape: f32[2,1,64], index: 8, kind: output, shape index: {1}]  }
   0x1   :  { %s1453_s29 = smov 0  }
   0x2 LB: > { %s31_s30 = sadd.s32 1, %s1396_s28  ;;  %p1151_p0 = scmp.ge.s32.totalorder %s1400_s29, 1  ;;  %s1400_s29 = sphi %s1453_s29, %s19_s29   ;;  %s1396_s28 = sphi %s1451_s28, %s1685_s28   ;;  %s1392_s27 = sphi %s1449_s27, %s1684_s27  }
   0x3   : > { %p33_p1 = scmp.ge.s32.totalorder %s31_s30, 2  ;;  %p287_p2 = scmp.lt.s32.totalorder %s1400_s29, 3 }
   0x5   : > { %s1687_s30 = smov (%p33_p1, %s31_s30), 0  ;;  %p288_p3 = pnand %p1151_p0, %p287_p2 }
   0x6   : > { %p334_p4 = scmp.lt.s32.totalorder (!%p288_p3), %s1392_s27, 1 }
   0x7   : > { %291 = sbr.rel (%p288_p3) target bundleno = 715 (0x2cb), region = 48 }
   0xc   : > { %v1331_v0 = vld [vmem:[%s1676_s1 + $0x78] sm:$0xff]   ;;  %vm362_vm0 = vcmask 516096   ;;  %s1689_s27 = smov (!%p334_p4, %s1392_s27), 1  ;;  %v1335_v4 = vld [vmem:[%s1676_s1 + $0x70] sm:$0xff]   ;;  %v1402_v6 = vmov 0.0   ;;  %v1339_v9 = vld [vmem:[%s1676_s1 + $0x68] sm:$0xff]  }
   0xd   : > { %v1332_v1 = vld [vmem:[%s1676_s1 + $0x38] sm:$0xff]   ;;  %1208 = vmatprep.subr.bf16.mxu0 %v1331_v0  ;;  %s1488_s21 = scalar_lea.vmem %s1683_s8, %s1689_s27  ;;  %v1336_v5 = vld [vmem:[%s1676_s1 + $0x30] sm:$0xff]   ;;  %v1340_v10 = vld [vmem:[%s1676_s1 + $0x28] sm:$0xff]   ;;  %s1304_s10 = smul.u32 40, %s1689_s27  ;;  %vm1403_vm1 = vmmov 0   ;;  %vm690_vm2 = vcmask 523264  }
   0xe   : > { %v1333_v2 = vld [vmem:[%s1676_s1 + $0xf8] sm:$0xff]   ;;  %1209 = vmatpush3.bf16.msra.mxu0 %v1332_v1  ;;  %363 = vst.msk [vmem:[%s1488_s21] sm:$0x1] %vm362_vm0, %v1402_v6  ;;  %v1337_v7 = vld [vmem:[%s1676_s1 + $0xf0] sm:$0xff]   ;;  %v1341_v11 = vld [vmem:[%s1676_s1 + $0xe8] sm:$0xff]   ;;  %s1205_s20 = sshll.u32 %s1689_s27, 3 }
   0xf   : > { %v1334_v3 = vld [vmem:[%s1676_s1 + $0xb8] sm:$0xff]   ;;  %1230 = vmatprep.subr.bf16.mxu1 %v1333_v2  ;;  %1210 = vmatprep.subr.bf16.mxu0 %v1335_v4  ;;  %v1338_v8 = vld [vmem:[%s1676_s1 + $0xb0] sm:$0xff]   ;;  %v1342_v12 = vld [vmem:[%s1676_s1 + $0xa8] sm:$0xff]   ;;  %s1569_s22 = scalar_lea.vmem %s1675_s0, %s1304_s10  ;;  %s352_s25 = scalar_lea.vmem %s1682_s7, %s1205_s20  ;;  %vm825_vm3 = vcmask 519168   ;;  %vm952_vm4 = vcmask 1043456   ;;  %vm948_vm6 = vcmask 31744  }
  0x10   : > { %1231 = vmatpush3.bf16.msra.mxu1 %v1334_v3  ;;  %v1343_v13 = vld [vmem:[%s1676_s1 + $0x60] sm:$0xff]   ;;  %v1347_v17 = vld [vmem:[%s1676_s1 + $0x58] sm:$0xff]   ;;  %v1351_v21 = vld [vmem:[%s1676_s1 + $0x50] sm:$0xff]  }
  0x11   : > { %1232 = vmatprep.subr.bf16.mxu1 %v1337_v7  ;;  %v1344_v14 = vld [vmem:[%s1676_s1 + $0x20] sm:$0xff]   ;;  %v1348_v18 = vld [vmem:[%s1676_s1 + $0x18] sm:$0xff]   ;;  %v1352_v22 = vld [vmem:[%s1676_s1 + $0x10] sm:$0xff]  }
  0x12   : > { %1211 = vmatpush3.bf16.msra.mxu0 %v1336_v5  ;;  %v1345_v15 = vld [vmem:[%s1676_s1 + $0xe0] sm:$0xff]   ;;  %v1349_v19 = vld [vmem:[%s1676_s1 + $0xd8] sm:$0xff]   ;;  %v1353_v23 = vld [vmem:[%s1676_s1 + $0xd0] sm:$0xff]  }
  0x13   : > { %1212 = vmatprep.subr.bf16.mxu0 %v1339_v9  ;;  %v1346_v16 = vld [vmem:[%s1676_s1 + $0xa0] sm:$0xff]   ;;  %v1350_v20 = vld [vmem:[%s1676_s1 + $0x98] sm:$0xff]   ;;  %v1354_v24 = vld [vmem:[%s1676_s1 + $0x90] sm:$0xff]  }
  0x14   : > { %1233 = vmatpush3.bf16.msra.mxu1 %v1338_v8  ;;  %v1355_v25 = vld [vmem:[%s1676_s1 + $0x48] sm:$0xff]   ;;  %v1359_v29 = vld [vmem:[%s1676_s1 + $0x40] sm:$0xff]   ;;  %v1369_v37 = vld [vmem:[%s1676_s1 + $0x118] sm:$0xff]  }
  0x15   : > { %1234 = vmatprep.subr.bf16.mxu1 %v1341_v11  ;;  %v1356_v26 = vld [vmem:[%s1676_s1 + $0x8] sm:$0xff]   ;;  %v1360_v30 = vld [vmem:[%s1676_s1] sm:$0xff]   ;;  %v1370_v38 = vld [vmem:[%s1676_s1 + $0x110] sm:$0xff]  }
  0x16   : > { %1213 = vmatpush3.bf16.msra.mxu0 %v1340_v10  ;;  %v1357_v27 = vld [vmem:[%s1676_s1 + $0xc8] sm:$0xff]   ;;  %v1361_v31 = vld [vmem:[%s1676_s1 + $0xc0] sm:$0xff]   ;;  %v868_v42 = vld [vmem:[%s1678_s3 + $0x38] sm:$0xff] }
  0x17   : > { %1214 = vmatprep.subr.bf16.mxu0 %v1343_v13  ;;  %v1358_v28 = vld [vmem:[%s1676_s1 + $0x88] sm:$0xff]   ;;  %v1362_v32 = vld [vmem:[%s1569_s22] ss:$20 sps:$4 sm:$0xff]   ;;  %v1364_v33 = vld [vmem:[%s1569_s22 + $0x4] ss:$20 sps:$4 sm:$0xff]  }
  0x18   : > { %1235 = vmatpush3.bf16.msra.mxu1 %v1342_v12  ;;  %v1365_v34 = vld [vmem:[%s1676_s1 + $0x80] sm:$0xff]   ;;  %726 = vmatprep.mubr.bf16.mxu0 %v1364_v33  ;;  %v1366_v35 = vld [vmem:[%s1569_s22 + $0x8] ss:$20 sps:$4 sm:$0xff]   ;;  %v867_v43 = vld [vmem:[%s1678_s3 + $0x30] sm:$0xff] }
  0x19   : > { %1236 = vmatprep.subr.bf16.mxu1 %v1345_v15  ;;  %v1368_v36 = vld [vmem:[%s1569_s22 + $0xc] ss:$20 sps:$4 sm:$0xff]   ;;  %v1373_v41 = vld [vmem:[%s1569_s22 + $0x10] ss:$20 sps:$4 sm:$0xff]   ;;  %v864_v46 = vld [vmem:[%s1678_s3 + $0x18] sm:$0xff] }
  0x1a   : > { %1215 = vmatpush3.bf16.msra.mxu0 %v1344_v14  ;;  %767 = vmatprep.mubr.bf16.mxu1 %v1368_v36  ;;  %v1371_v39 = vld [vmem:[%s1676_s1 + $0x108] sm:$0xff]   ;;  %v1372_v40 = vld [vmem:[%s1676_s1 + $0x100] sm:$0xff]   ;;  %v863_v47 = vld [vmem:[%s1678_s3 + $0x10] sm:$0xff] }
  0x1b   : > { %1216 = vmatprep.subr.bf16.mxu0 %v1347_v17  ;;  %v866_v44 = vld [vmem:[%s1678_s3 + $0x28] sm:$0xff]  ;;  %v865_v45 = vld [vmem:[%s1678_s3 + $0x20] sm:$0xff] }
  0x1c   : > { %1237 = vmatpush3.bf16.msra.mxu1 %v1346_v16  ;;  %v862_v48 = vld [vmem:[%s1678_s3 + $0x8] sm:$0xff]  ;;  %v861_v49 = vld [vmem:[%s1678_s3] sm:$0xff] }
  0x1d   : > { %1238 = vmatprep.subr.bf16.mxu1 %v1349_v19  ;;  %v1155_v56 = vld [vmem:[%s1677_s2] ss:$0 sm:$0xff] }
  0x1e   : > { %1217 = vmatpush3.bf16.msra.mxu0 %v1348_v18 }
  0x1f   : > { %1218 = vmatprep.subr.bf16.mxu0 %v1351_v21 }
  0x20   : > { %1239 = vmatpush3.bf16.msra.mxu1 %v1350_v20  ;;  %v843_v20 = vld [vmem:[%s1488_s21] sm:$0x1] }
  0x21   : > { %1240 = vmatprep.subr.bf16.mxu1 %v1353_v23 }
  0x22   : > { %1219 = vmatpush3.bf16.msra.mxu0 %v1352_v22 }
  0x23   : > { %1220 = vmatprep.subr.bf16.mxu0 %v1355_v25  ;;  %v946_v25 = vld [vmem:[%s1680_s5] sm:$0xf] }
  0x24   : > { %1241 = vmatpush3.bf16.msra.mxu1 %v1354_v24 }
  0x25   : > { %1242 = vmatprep.subr.bf16.mxu1 %v1357_v27 }
  0x26   : > { %1221 = vmatpush3.bf16.msra.mxu0 %v1356_v26  ;;  %v869_v26 = vld [vmem:[%s1679_s4] sm:$0x1] }
  0x27   : > { %1222 = vmatprep.subr.bf16.mxu0 %v1359_v29 }
  0x28   : > { %1243 = vmatpush3.bf16.msra.mxu1 %v1358_v28 }
  0x29   : > { %1244 = vmatprep.subr.bf16.mxu1 %v1361_v31 }
  0x2a   : > { %1223 = vmatpush3.bf16.msra.mxu0 %v1360_v30 }
  0x2b   : > { %1268 = vmatprep.subr.bf16.mxu0 %v1402_v6 }
  0x2c   : > { %1245 = vmatpush3.bf16.msra.mxu1 %v1365_v34 }
  0x2d   : > { %727 = vmatmul.mubr.bf16.vlgmr.msra.gmra.mxu0 %v1362_v32  ;;  %1280 = vmatprep.subr.mxu1 %v1402_v6 }
  0x2e   : > { %1276 = vmatprep.mubr.msk.bf16.mxu0 %vm1403_vm1, %v1402_v6  ;;  %1269 = vmatpush3.bf16.msra.mxu0 %v1369_v37 }
  0x2f   : > { %768 = vmatmul.mubr.bf16.vlgmr.msra.gmra.mxu1 %v1366_v35  ;;  %1270 = vmatprep.subr.bf16.mxu0 %v1402_v6 }
  0x30   : > { %1296 = vmatprep.mubr.msk.f32.mxu1 %vm1403_vm1, %v1402_v6  ;;  %1281 = vmatpush3.msra.mxu1 %v868_v42 }
  0x31   : > { %1282 = vmatprep.subr.mxu1 %v1402_v6 }
  0x32   : > { %1271 = vmatpush3.bf16.msra.mxu0 %v1370_v38  ;;  %1283 = vmatpush3.msra.mxu1 %v867_v43 }
  0x33   : > { %1272 = vmatprep.subr.bf16.mxu0 %v1402_v6  ;;  %1284 = vmatprep.subr.mxu1 %v1402_v6 }
  0x34   : > { %1285 = vmatpush3.msra.mxu1 %v866_v44 }
  0x35   : > { %1286 = vmatprep.subr.mxu1 %v1402_v6 }
  0x36   : > { %1273 = vmatpush3.bf16.msra.mxu0 %v1371_v39  ;;  %1287 = vmatpush3.msra.mxu1 %v865_v45 }
  0x37   : > { %1274 = vmatprep.subr.bf16.mxu0 %v1402_v6  ;;  %1288 = vmatprep.subr.mxu1 %v1402_v6 }
  0x38   : > { %1289 = vmatpush3.msra.mxu1 %v864_v46 }
  0x39   : > { %1290 = vmatprep.subr.mxu1 %v1402_v6 }
  0x3a   : > { %1275 = vmatpush3.bf16.msra.mxu0 %v1372_v40  ;;  %1291 = vmatpush3.msra.mxu1 %v863_v47 }
  0x3b   : > { %1292 = vmatprep.subr.mxu1 %v1402_v6 }
  0x3c   : > { %1293 = vmatpush3.msra.mxu1 %v862_v48 }
  0x3d   : > { %1277 = vmatmul.mubr.msk.bf16.vlgmr.msra.gmra.mxu0 %vm690_vm2, %v1373_v41  ;;  %1294 = vmatprep.subr.mxu1 %v1402_v6 }
  0x3e   : > { %1295 = vmatpush3.msra.mxu1 %v861_v49 }
  0x3f   : > { %1299 = vmatprep.subr.mxu1 %v1402_v6 }
  0xed   : > { %v1224_v50 = vpop.f32.mrf.mxu0 }
  0xef   : > { %v1225_v51 = vpop.f32.mrf.mxu0  ;;  %v1246_v52 = vpop.f32.mrf.mxu1 }
  0xf0   : > { %v1226_v55 = vadd.f32 %v1225_v51, %v1224_v50 }
  0xf1   : > { %v1227_v53 = vpop.f32.mrf.mxu0  ;;  %v1247_v54 = vpop.f32.mrf.mxu1 }
  0xf2   : > { %v729_v59 = vadd.f32 %v1226_v55, %v1155_v56  ;;  %v1248_v60 = vadd.f32 %v1247_v54, %v1246_v52 }
  0xf3   : > { %v1228_v57 = vpop.f32.mrf.mxu0  ;;  %v1249_v58 = vpop.f32.mrf.mxu1 }
  0xf4   : > { %v1229_v61 = vadd.f32 %v1228_v57, %v1227_v53  ;;  %v770_v1 = vadd.f32 %v1248_v60, %v729_v59 }
  0xf5   : > { %v1250_v62 = vpop.f32.mrf.mxu1 }
  0xf6   : > { %v732_v63 = vadd.f32 %v1229_v61, %v1155_v56  ;;  %v1251_v0 = vadd.f32 %v1250_v62, %v1249_v58 }
  0xf8   : > { %v773_v7 = vadd.f32 %v1251_v0, %v732_v63 }
  0xfd   : > { %v810_v2 = vpop.f32.mrf.mxu0 }
  0xfe   : > { %v811_v3 = vadd.f32 %v810_v2, %v770_v1 }
  0xff   : > { %v1278_v4 = vpop.f32.mrf.mxu0 }
 0x100   : > { %v1206_v5 = vpack.c.bf16 %v811_v3, %v811_v3  ;;  %v844_v11 = vsel %vm690_vm2, %v811_v3, 0.0 }
 0x101   : > { %v813_v8 = vpop.f32.mrf.mxu0 }
 0x102   : > { %826 = vst.msk [vmem:[%s352_s25] sm:$0xf] %vm825_vm3, %v1206_v5  ;;  %v814_v9 = vadd.f32 %v813_v8, %v773_v7 }
 0x103   : > { %v1279_v10 = vpop.f32.mrf.mxu0 }
 0x104   : > { %v1207_v12 = vpack.c.bf16 %v814_v9, %v814_v9  ;;  %v845_v13 = vsel %vm690_vm2, %v814_v9, 0.0 }
 0x105   : > { %v846_v14 = vadd.f32 %v845_v13, %v844_v11 }
 0x106   : > { %827 = vst.msk [vmem:[%s352_s25 + $0x4] sm:$0xf] %vm825_vm3, %v1207_v12 }
 0x107   : > { %v847_v15 = vrot.slane %v846_v14, 4 }
 0x109   : > { %v848_v16 = vadd.f32 %v847_v15, %v846_v14 }
 0x10b   : > { %v849_v17 = vrot.slane %v848_v16, 2 }
 0x10d   : > { %v850_v18 = vadd.f32 %v849_v17, %v848_v16 }
 0x10f   : > { %v851_v19 = vrot.slane %v850_v18, 1 }
 0x111   : > { %v852_v21 = vadd.f32 %v851_v19, %v850_v18 }
 0x113   : > { %v853_v22 = vadd.f32 %v852_v21, %v843_v20 }
 0x115   : > { %855 = vst.msk [vmem:[%s1488_s21] sm:$0x1] %vm362_vm0, %v853_v22 }
 0x11c   : > { %v859_v23 = vld [vmem:[%s1488_s21] sm:$0x1] }
 0x11d   : > { %v860_v24 = vmul.f32 0.0625, %v859_v23 }
 0x11f   : > { %1297 = vmatmul.mubr.msk.f32.vlgmr.msra.gmra.mxu1 %vm690_vm2, %v860_v24 }
 0x120   : > { %1301 = vmatprep.mubr.msk.f32.mxu1 %vm1403_vm1, %v1402_v6  ;;  %1300 = vmatpush3.msk.msra.mxu1 %vm952_vm4, %v946_v25  ;;  %v947_v6 = vld [vmem:[%s1681_s6] sm:$0x1] }
 0x1df   : > { %v939_v27 = vpop.f32.mrf.mxu1 }
 0x1e0   : > { %v940_v28 = vadd.f32 %v939_v27, %v869_v26 }
 0x1e1   : > { %v1298_v29 = vpop.f32.mrf.mxu1 }
 0x1e2   : > { %vm943_vm5 = vcmp.ge.f32.partialorder %v940_v28, 0.0  ;;  %v944_v30 = vmul.f32 0.2, %v940_v28 }
 0x1e4   : > { %v945_v31 = vsel %vm943_vm5, %v940_v28, %v944_v30 }
 0x1e5   : > { %1302 = vmatmul.mubr.msk.f32.vlgmr.msra.gmra.mxu1 %vm948_vm6, %v945_v31 }
 0x2a5   : > { %v1022_v32 = vpop.f32.mrf.mxu1 }
 0x2a6   : > { %v1023_v33 = vadd.f32 %v1022_v32, %v947_v6 }
 0x2a7   : > { %v1303_v34 = vpop.f32.mrf.mxu1 }
 0x2a8   : > { %v1026_v35 = vsub.f32 0.0, %v1023_v33 }
 0x2aa   : > { %v1027_v36 = vmul.f32 1.442695, %v1026_v35 }
 0x2ac   : > { %1374 = vpow2.f32 %v1027_v36 }
 0x2b9   : > { %v1375_v37 = vpop.eup %1374 }
 0x2ba   : > { %v1029_v38 = vadd.f32 1.0, %v1375_v37 }
 0x2bc   : > { %1376 = vrcp.f32 %v1029_v38 }
 0x2c9   : > { %v1377_v39 = vpop.eup %1376 }
 0x2ca   : > { %1031 = vst.msk [vmem:[%s1488_s21] sm:$0x1] %vm362_vm0, %v1377_v39 }
 0x2cb PF: > { %s19_s29 = sadd.s32 1, %s1400_s29   ;;  %s1684_s27 = smov %s1396_s28 }
 0x2cc   : > { %p16_p5 = scmp.ge.s32.totalorder %s19_s29, 4   ;;  %s1685_s28 = smov %s1687_s30 }
 0x2ce   :  { %18 = sbr.rel (!%p16_p5) target bundleno = 2 (0x2), region = 98 }

// kernel: kernelnet_forward.51
= control target key start
LH: loop header
LB: loop body
LE: loop exit
PB: predicated region body
PF: predicated region fallthrough
CT: control target
= control target key end

     0   :  { %v496_v27 = vmov 1983009808   ;;  %v102_v29 = vlaneseq  ;;  %s750_s0 = inlined_call_operand.vmem [shape: f32[2,576], index: 0, kind: input, shape index: {}]   ;;  %s751_s1 = inlined_call_operand.vmem [shape: f32[576,3], index: 1, kind: input, shape index: {}]   ;;  %s752_s2 = inlined_call_operand.vmem [shape: f32[1,3], index: 2, kind: input, shape index: {}]   ;;  %s753_s3 = inlined_call_operand.hbm [shape: f32[2,3], index: 3, kind: output, shape index: {}]  }
   0x1   :  { %v48_v0 = vld [vmem:[%s751_s1 + $0xf8] sm:$0xff]  ;;  %v47_v2 = vld [vmem:[%s751_s1 + $0xf0] sm:$0xff]  ;;  %v46_v6 = vld [vmem:[%s751_s1 + $0xe8] sm:$0xff]  ;;  %v100_v28 = vunpack.c.l.s4 %v496_v27 }
   0x2   :  { %v32_v1 = vld [vmem:[%s751_s1 + $0x78] sm:$0xff]  ;;  %367 = vmatprep.subr.mxu0 %v48_v0  ;;  %v31_v4 = vld [vmem:[%s751_s1 + $0x70] sm:$0xff]  ;;  %v30_v8 = vld [vmem:[%s751_s1 + $0x68] sm:$0xff]  ;;  %v103_v39 = vshrl.u32 %v102_v29, 7 }
   0x3   :  { %v80_v3 = vld [vmem:[%s751_s1 + $0x1f8] sm:$0xff]  ;;  %368 = vmatpush3.msra.mxu0 %v32_v1  ;;  %v79_v7 = vld [vmem:[%s751_s1 + $0x1f0] sm:$0xff]  ;;  %v78_v10 = vld [vmem:[%s751_s1 + $0x1e8] sm:$0xff]  ;;  %v101_v38 = vunpack.c.0.s8 %v100_v28 }
   0x4   :  { %v64_v5 = vld [vmem:[%s751_s1 + $0x178] sm:$0xff]  ;;  %402 = vmatprep.subr.mxu1 %v80_v3  ;;  %369 = vmatprep.subr.mxu0 %v47_v2  ;;  %v63_v9 = vld [vmem:[%s751_s1 + $0x170] sm:$0xff]  ;;  %v45_v11 = vld [vmem:[%s751_s1 + $0xe0] sm:$0xff] }
   0x5   :  { %403 = vmatpush3.msra.mxu1 %v64_v5  ;;  %370 = vmatpush3.msra.mxu0 %v31_v4  ;;  %v62_v12 = vld [vmem:[%s751_s1 + $0x168] sm:$0xff]  ;;  %v29_v13 = vld [vmem:[%s751_s1 + $0x60] sm:$0xff]  ;;  %v44_v15 = vld [vmem:[%s751_s1 + $0xd8] sm:$0xff]  ;;  %v104_v48 = vsub.s32 %v101_v38, %v103_v39 }
   0x6   :  { %404 = vmatprep.subr.mxu1 %v79_v7  ;;  %371 = vmatprep.subr.mxu0 %v46_v6  ;;  %v77_v14 = vld [vmem:[%s751_s1 + $0x1e0] sm:$0xff]  ;;  %v28_v17 = vld [vmem:[%s751_s1 + $0x58] sm:$0xff]  ;;  %v43_v19 = vld [vmem:[%s751_s1 + $0xd0] sm:$0xff] }
   0x7   :  { %405 = vmatpush3.msra.mxu1 %v63_v9  ;;  %372 = vmatpush3.msra.mxu0 %v30_v8  ;;  %v61_v16 = vld [vmem:[%s751_s1 + $0x160] sm:$0xff]  ;;  %v76_v18 = vld [vmem:[%s751_s1 + $0x1d8] sm:$0xff]  ;;  %v27_v21 = vld [vmem:[%s751_s1 + $0x50] sm:$0xff] }
   0x8   :  { %406 = vmatprep.subr.mxu1 %v78_v10  ;;  %373 = vmatprep.subr.mxu0 %v45_v11  ;;  %v60_v20 = vld [vmem:[%s751_s1 + $0x158] sm:$0xff]  ;;  %v75_v22 = vld [vmem:[%s751_s1 + $0x1d0] sm:$0xff]  ;;  %v42_v23 = vld [vmem:[%s751_s1 + $0xc8] sm:$0xff] }
   0x9   :  { %407 = vmatpush3.msra.mxu1 %v62_v12  ;;  %374 = vmatpush3.msra.mxu0 %v29_v13  ;;  %v59_v24 = vld [vmem:[%s751_s1 + $0x150] sm:$0xff]  ;;  %v26_v25 = vld [vmem:[%s751_s1 + $0x48] sm:$0xff]  ;;  %v41_v30 = vld [vmem:[%s751_s1 + $0xc0] sm:$0xff] }
   0xa   :  { %408 = vmatprep.subr.mxu1 %v77_v14  ;;  %375 = vmatprep.subr.mxu0 %v44_v15  ;;  %v74_v26 = vld [vmem:[%s751_s1 + $0x1c8] sm:$0xff]  ;;  %v25_v32 = vld [vmem:[%s751_s1 + $0x40] sm:$0xff]  ;;  %v40_v34 = vld [vmem:[%s751_s1 + $0xb8] sm:$0xff] }
   0xb   :  { %409 = vmatpush3.msra.mxu1 %v61_v16  ;;  %376 = vmatpush3.msra.mxu0 %v28_v17  ;;  %v58_v31 = vld [vmem:[%s751_s1 + $0x148] sm:$0xff]  ;;  %v73_v33 = vld [vmem:[%s751_s1 + $0x1c0] sm:$0xff]  ;;  %v24_v36 = vld [vmem:[%s751_s1 + $0x38] sm:$0xff] }
   0xc   :  { %410 = vmatprep.subr.mxu1 %v76_v18  ;;  %377 = vmatprep.subr.mxu0 %v43_v19  ;;  %v57_v35 = vld [vmem:[%s751_s1 + $0x140] sm:$0xff]  ;;  %v72_v37 = vld [vmem:[%s751_s1 + $0x1b8] sm:$0xff]  ;;  %v39_v40 = vld [vmem:[%s751_s1 + $0xb0] sm:$0xff] }
   0xd   :  { %411 = vmatpush3.msra.mxu1 %v60_v20  ;;  %378 = vmatpush3.msra.mxu0 %v27_v21  ;;  %v56_v41 = vld [vmem:[%s751_s1 + $0x138] sm:$0xff]  ;;  %v23_v42 = vld [vmem:[%s751_s1 + $0x30] sm:$0xff]  ;;  %v38_v44 = vld [vmem:[%s751_s1 + $0xa8] sm:$0xff] }
   0xe   :  { %412 = vmatprep.subr.mxu1 %v75_v22  ;;  %379 = vmatprep.subr.mxu0 %v42_v23  ;;  %v71_v43 = vld [vmem:[%s751_s1 + $0x1b0] sm:$0xff]  ;;  %v22_v46 = vld [vmem:[%s751_s1 + $0x28] sm:$0xff]  ;;  %v37_v49 = vld [vmem:[%s751_s1 + $0xa0] sm:$0xff] }
   0xf   :  { %413 = vmatpush3.msra.mxu1 %v59_v24  ;;  %380 = vmatpush3.msra.mxu0 %v26_v25  ;;  %v55_v45 = vld [vmem:[%s751_s1 + $0x130] sm:$0xff]  ;;  %v70_v47 = vld [vmem:[%s751_s1 + $0x1a8] sm:$0xff]  ;;  %v15_v51 = vld [vmem:[%s750_s0] sm:$0xff] }
  0x10   :  { %414 = vmatprep.subr.mxu1 %v74_v26  ;;  %381 = vmatprep.subr.mxu0 %v41_v30  ;;  %v54_v50 = vld [vmem:[%s751_s1 + $0x128] sm:$0xff]  ;;  %v21_v52 = vld [vmem:[%s751_s1 + $0x20] sm:$0xff]  ;;  %v36_v54 = vld [vmem:[%s751_s1 + $0x98] sm:$0xff]  ;;  %v105_v58 = vrot.slane %v15_v51, %v104_v48  ;;  %v98_v59 = vcombine.high %v15_v51, %v15_v51 }
  0x11   :  { %415 = vmatpush3.msra.mxu1 %v58_v31  ;;  %382 = vmatpush3.msra.mxu0 %v25_v32  ;;  %v69_v53 = vld [vmem:[%s751_s1 + $0x1a0] sm:$0xff]  ;;  %v20_v56 = vld [vmem:[%s751_s1 + $0x18] sm:$0xff]  ;;  %v35_v60 = vld [vmem:[%s751_s1 + $0x90] sm:$0xff] }
  0x12   :  { %416 = vmatprep.subr.mxu1 %v73_v33  ;;  %383 = vmatprep.subr.mxu0 %v40_v34  ;;  %v53_v55 = vld [vmem:[%s751_s1 + $0x120] sm:$0xff]  ;;  %v68_v57 = vld [vmem:[%s751_s1 + $0x198] sm:$0xff]  ;;  %v19_v62 = vld [vmem:[%s751_s1 + $0x10] sm:$0xff] }
  0x13   :  { %417 = vmatpush3.msra.mxu1 %v57_v35  ;;  %384 = vmatpush3.msra.mxu0 %v24_v36  ;;  %v52_v61 = vld [vmem:[%s751_s1 + $0x118] sm:$0xff]  ;;  %v67_v63 = vld [vmem:[%s751_s1 + $0x190] sm:$0xff] }
  0x14   :  { %418 = vmatprep.subr.mxu1 %v72_v37  ;;  %385 = vmatprep.subr.mxu0 %v39_v40 }
  0x15   :  { %419 = vmatpush3.msra.mxu1 %v56_v41  ;;  %386 = vmatpush3.msra.mxu0 %v23_v42 }
  0x16   :  { %420 = vmatprep.subr.mxu1 %v71_v43  ;;  %387 = vmatprep.subr.mxu0 %v38_v44 }
  0x17   :  { %421 = vmatpush3.msra.mxu1 %v55_v45  ;;  %388 = vmatpush3.msra.mxu0 %v22_v46 }
  0x18   :  { %422 = vmatprep.subr.mxu1 %v70_v47  ;;  %389 = vmatprep.subr.mxu0 %v37_v49 }
  0x19   :  { %423 = vmatpush3.msra.mxu1 %v54_v50  ;;  %390 = vmatpush3.msra.mxu0 %v21_v52 }
  0x1a   :  { %424 = vmatprep.subr.mxu1 %v69_v53  ;;  %391 = vmatprep.subr.mxu0 %v36_v54 }
  0x1b   :  { %425 = vmatpush3.msra.mxu1 %v53_v55 }
  0x1c   :  { %8 = vsyncpa [#allocation3], 0  ;;  %392 = vmatpush3.msra.mxu0 %v20_v56  ;;  %426 = vmatprep.subr.mxu1 %v68_v57  ;;  %v34_v0 = vld [vmem:[%s751_s1 + $0x88] sm:$0xff]  ;;  %v51_v1 = vld [vmem:[%s751_s1 + $0x110] sm:$0xff]  ;;  %v113_v4 = vcombine.high %v105_v58, %v105_v58  ;;  %v112_v5 = vrot.slane %v98_v59, %v104_v48  ;;  %v497_v13 = vmov 0.0   ;;  %vm498_vm0 = vmmov 0  }
  0x1d   :  { %393 = vmatprep.subr.mxu0 %v35_v60  ;;  %427 = vmatpush3.msra.mxu1 %v52_v61  ;;  %v18_v2 = vld [vmem:[%s751_s1 + $0x8] sm:$0xff]  ;;  %v33_v6 = vld [vmem:[%s751_s1 + $0x80] sm:$0xff]  ;;  %v88_v12 = vld [vmem:[%s751_s1 + $0x238] sm:$0xff]  ;;  %vm126_vm1 = vcmask 523264   ;;  %v345_v38 = vand.u32 127, %v102_v29  ;;  %vm348_vm3 = vcmask 17408  }
  0x1e   :  { %v66_v3 = vld [vmem:[%s751_s1 + $0x188] sm:$0xff]  ;;  %394 = vmatpush3.msra.mxu0 %v19_v62  ;;  %428 = vmatprep.subr.mxu1 %v67_v63  ;;  %v17_v7 = vld [vmem:[%s751_s1] sm:$0xff]  ;;  %v114_v11 = vcombine.high %v112_v5, %v112_v5  ;;  %v87_v14 = vld [vmem:[%s751_s1 + $0x230] sm:$0xff] }
  0x1f   :  { %395 = vmatprep.subr.mxu0 %v34_v0  ;;  %429 = vmatpush3.msra.mxu1 %v51_v1  ;;  %v50_v8 = vld [vmem:[%s751_s1 + $0x108] sm:$0xff]  ;;  %v65_v9 = vld [vmem:[%s751_s1 + $0x180] sm:$0xff]  ;;  %v84_v17 = vld [vmem:[%s751_s1 + $0x218] sm:$0xff]  ;;  %vm346_vm2 = vcmp.lt.s32.totalorder %v345_v38, 2 }
  0x20   :  { %396 = vmatpush3.msra.mxu0 %v18_v2  ;;  %430 = vmatprep.subr.mxu1 %v66_v3  ;;  %v49_v10 = vld [vmem:[%s751_s1 + $0x100] sm:$0xff]  ;;  %v86_v15 = vld [vmem:[%s751_s1 + $0x228] sm:$0xff]  ;;  %v83_v18 = vld [vmem:[%s751_s1 + $0x210] sm:$0xff] }
  0x21   :  { %397 = vmatprep.subr.mxu0 %v33_v6  ;;  %193 = vmatprep.mubr.f32.mxu0 %v113_v4  ;;  %v85_v16 = vld [vmem:[%s751_s1 + $0x220] sm:$0xff]  ;;  %v82_v19 = vld [vmem:[%s751_s1 + $0x208] sm:$0xff] }
  0x22   :  { %398 = vmatpush3.msra.mxu0 %v17_v7  ;;  %431 = vmatpush3.msra.mxu1 %v50_v8  ;;  %v81_v20 = vld [vmem:[%s751_s1 + $0x200] sm:$0xff]  ;;  %v365_v21 = vld.sshfl [vmem:[%s750_s0 + $0x8] sm:$0x3 pattern:$0x76325410]  ;;  %s499_s0 = smov [#allocation2]  }
  0x23   :  { %194 = vmatmul.mubr.f32.vlgmr.msra.gmra.mxu0 %v105_v58  ;;  %432 = vmatprep.subr.mxu1 %v65_v9  ;;  %v364_v26 = vld [vmem:[%s752_s2] ss:$0 sm:$0xff]  ;;  %s356_s1 = sshll.u32 %s499_s0, 4  ;;  %s357_s1 = int_to_ptr.vmem [resolvable:$true] %s356_s1 }
  0x24   :  { %446 = vmatprep.subr.mxu0 %v497_v13  ;;  %433 = vmatpush3.msra.mxu1 %v49_v10  ;;  %s474_s2 = scalar_lea.vmem %s357_s1, 32  ;;  %p479_p1 = scmp.lt.s32.totalorder %s357_s1, %s357_s1 }
  0x25   :  { %263 = vmatprep.mubr.f32.mxu1 %v114_v11  ;;  %447 = vmatpush3.msra.mxu0 %v88_v12  ;;  %p475_p0 = scmp.ne.s32.totalorder %s357_s1, %s474_s2  ;;  %p480_p2 = scmp.lt.s32.totalorder %s474_s2, %s474_s2 }
  0x26   :  { %264 = vmatmul.mubr.f32.vlgmr.msra.gmra.mxu1 %v112_v5  ;;  %448 = vmatprep.subr.mxu0 %v497_v13 }
  0x27   :  { %449 = vmatpush3.msra.mxu0 %v87_v14  ;;  %462 = vmatprep.mubr.msk.f32.mxu0 %vm498_vm0, %v497_v13  ;;  %p481_p3 = por %p480_p2, %p479_p1 }
  0x28   :  { %450 = vmatprep.subr.mxu0 %v497_v13 }
  0x29   :  { %451 = vmatpush3.msra.mxu0 %v86_v15  ;;  %p482_p4 = pnand %p481_p3, %p475_p0 }
  0x2a   :  { %452 = vmatprep.subr.mxu0 %v497_v13 }
  0x2b   :  { %453 = vmatpush3.msra.mxu0 %v85_v16 }
  0x2c   :  { %454 = vmatprep.subr.mxu0 %v497_v13 }
  0x2d   :  { %455 = vmatpush3.msra.mxu0 %v84_v17 }
  0x2e   :  { %456 = vmatprep.subr.mxu0 %v497_v13 }
  0x2f   :  { %457 = vmatpush3.msra.mxu0 %v83_v18 }
  0x30   :  { %458 = vmatprep.subr.mxu0 %v497_v13 }
  0x31   :  { %459 = vmatpush3.msra.mxu0 %v82_v19 }
  0x32   :  { %460 = vmatprep.subr.mxu0 %v497_v13 }
  0x33   :  { %461 = vmatpush3.msra.mxu0 %v81_v20 }
  0x34   :  { %463 = vmatmul.mubr.msk.f32.vlgmr.msra.gmra.mxu0 %vm126_vm1, %v365_v21 }
  0xe3   :  { %v399_v22 = vpop.f32.mrf.mxu0 }
  0xe5   :  { %v400_v23 = vpop.f32.mrf.mxu0 }
  0xe6   :  { %v434_v24 = vpop.f32.mrf.mxu1  ;;  %v401_v25 = vadd.f32 %v400_v23, %v399_v22 }
  0xe8   :  { %v435_v27 = vpop.f32.mrf.mxu1  ;;  %v196_v28 = vadd.f32 %v401_v25, %v364_v26 }
  0xe9   :  { %v436_v30 = vadd.f32 %v435_v27, %v434_v24 }
  0xeb   :  { %v266_v31 = vadd.f32 %v436_v30, %v196_v28 }
  0xf4   :  { %v335_v32 = vpop.f32.mrf.mxu0 }
  0xf5   :  { %v336_v33 = vadd.f32 %v335_v32, %v266_v31 }
  0xf6   :  { %v464_v34 = vpop.f32.mrf.mxu0 }
  0xf7   :  { %v339_v35 = vmax.f32 %v336_v33, -9.2103405  ;;  %470 = vtanh.f32 %v336_v33 }
  0xf9   :  { %v340_v36 = vmin.f32 %v339_v35, 4.6051702 }
  0xfb   :  { %v341_v37 = vmul.f32 1.442695, %v340_v36 }
  0xfd   :  { %472 = vpow2.f32 %v341_v37 }
 0x104   :  { %v471_v39 = vpop.eup %470 }
 0x10a   :  { %v473_v40 = vpop.eup %472 }
 0x10b   :  { %v347_v41 = vsel %vm346_vm2, %v473_v40, %v471_v39 }
 0x10c   :  { %349 = vst.msk [vmem:[#allocation2] sm:$0x3] %vm348_vm3, %v347_v41 }
 0x10d   :  { %485 = shalt.err (!%p482_p4)
}
 0x10e   :  { %359 = dma.vmem_to_hbm [thread:$0]  %s357_s1, 32, %s753_s3, [#allocation3]  }
 0x10f   :  { %494 = dma.done.wait [#allocation3], 32  }
 0x110   :  { %495 = vsyncadd [#allocation3], 4294967264 }
 0x111   :  { %363 = vsyncpa [#allocation3], 1 }

</bundles_post_ra>
